<compile_context>
chip_gen: v7x
topology: tpu7x:2x2x1
jax: 0.10.0
libtpu: 0.0.40
codegen_flags: <defaults>
</compile_context>

<pallas_src>
import math
import functools

import jax
import jax.numpy as jnp
from jax.experimental import pallas as pl
from jax.experimental.pallas import tpu as pltpu


def _attention_gate_kernel(xfull_ref,
                           wq_ref, bq_ref, wk_ref, bk_ref, wv_ref, bv_ref,
                           wo_ref, bo_ref, wgq_ref, wga_ref, bg_ref,
                           out_ref, alpha_ref,
                           k_hm, v_hm, q_hm, ctx_sl,
                           *, n_heads, d_kv, q_tile):
    f32 = jnp.float32
    cdt = xfull_ref.dtype              # compute dtype for MXU operands
    H, Dk, Tq = n_heads, d_kv, q_tile
    scale = 1.0 / math.sqrt(Dk)
    qi = pl.program_id(1)

    # ---- K/V projections: once per batch, stored head-major in VMEM ----
    @pl.when(qi == 0)
    def _():
        x = xfull_ref[0]                                                # (S, D)
        k = (jnp.dot(x, wk_ref[...], preferred_element_type=f32)
             + bk_ref[0]).astype(cdt)
        v = (jnp.dot(x, wv_ref[...], preferred_element_type=f32)
             + bv_ref[0]).astype(cdt)
        for h in range(H):
            sl = slice(h * Dk, (h + 1) * Dk)
            k_hm[h] = k[:, sl]                                          # (S, Dk)
            v_hm[h] = v[:, sl]

    # ---- Q projection for this query tile (sliced from the resident block) ----
    q0 = pl.multiple_of(qi * Tq, Tq)
    xq = xfull_ref[0, pl.ds(q0, Tq), :]                                 # (Tq, D)
    q_f32 = jnp.dot(xq, wq_ref[...], preferred_element_type=f32) + bq_ref[0]
    q_cdt = q_f32.astype(cdt)                 # unscaled q feeds the gate
    q_scaled = (q_f32 * scale).astype(cdt)    # fold 1/sqrt(d_kv) into q once
    for h in range(H):
        q_hm[h] = q_scaled[:, h * Dk:(h + 1) * Dk]                      # (Tq, Dk)

    # ---- head-batched attention (H is the leading batch dim) ----
    s = jnp.einsum('hqd,hkd->hqk', q_hm[...], k_hm[...],
                   preferred_element_type=f32)                          # (H, Tq, S)
    s = s - jnp.max(s, axis=-1, keepdims=True)
    p = jnp.exp(s)
    p = p * pl.reciprocal(jnp.sum(p, axis=-1, keepdims=True), approx=True)
    # TODO(synk): attention dropout skipped (inference / training=False).
    ctx = jnp.einsum('hqk,hkd->hqd', p.astype(cdt), v_hm[...],
                     preferred_element_type=f32)                        # (H, Tq, Dk)

    # scatter heads into a lane-dense (Tq, inner) slab -> single output matmul
    for h in range(H):
        ctx_sl[:, h * Dk:(h + 1) * Dk] = ctx[h].astype(cdt)

    attn_out = (jnp.dot(ctx_sl[...], wo_ref[...], preferred_element_type=f32)
                + bo_ref[0])                                            # (Tq, D)

    # gate: sigmoid([q | attn_out] @ Wg + bg); Wg pre-split in the wrapper
    gate_logits = (jnp.dot(q_cdt, wgq_ref[...], preferred_element_type=f32)
                   + jnp.dot(attn_out.astype(cdt), wga_ref[...],
                             preferred_element_type=f32)
                   + bg_ref[0])
    alpha = jax.nn.sigmoid(gate_logits)
    out = attn_out * alpha

    out_ref[0] = out.astype(out_ref.dtype)
    alpha_ref[0] = alpha.astype(alpha_ref.dtype)


def attention_with_gate(hidden_states, params, *, n_heads, d_kv, q_tile=None):
    """hidden_states: (B, S, D).  Returns (gated_hidden, None, (alpha,))."""
    B, S, D = hidden_states.shape
    inner = n_heads * d_kv
    assert inner == D, "gate requires inner_dim == d_model (T5 convention)"

    if q_tile is None:
        q_tile = 256 if S % 256 == 0 else S
    assert S % q_tile == 0, "sequence length must be divisible by q_tile"
    assert q_tile == S or q_tile % 8 == 0, "q_tile must be sublane-aligned"
    num_q = S // q_tile

    dt = hidden_states.dtype
    wq, bq = params["wq"], params["bq"].reshape(1, inner)
    wk, bk = params["wk"], params["bk"].reshape(1, inner)
    wv, bv = params["wv"], params["bv"].reshape(1, inner)
    wo, bo = params["wo"], params["bo"].reshape(1, D)
    wg, bg = params["wg"], params["bg"].reshape(1, D)
    wg_q, wg_a = wg[:inner, :], wg[inner:, :]        # pre-split gate weight

    kernel = functools.partial(_attention_gate_kernel,
                               n_heads=n_heads, d_kv=d_kv, q_tile=q_tile)

    def const_spec(arr):
        # constant-index blocks: DMA'd once, reused for the whole grid
        zeros = (0,) * arr.ndim
        return pl.BlockSpec(arr.shape, lambda b, q: zeros)

    x_full_spec = pl.BlockSpec((1, S, D), lambda b, q: (b, 0, 0))
    out_tile_spec = pl.BlockSpec((1, q_tile, D), lambda b, q: (b, q, 0))

    out, alpha = pl.pallas_call(
        kernel,
        out_shape=(jax.ShapeDtypeStruct((B, S, D), dt),
                   jax.ShapeDtypeStruct((B, S, D), dt)),
        grid_spec=pltpu.PrefetchScalarGridSpec(
            num_scalar_prefetch=0,
            grid=(B, num_q),
            in_specs=[
                x_full_spec,                    # x: full seq, one DMA per batch
                const_spec(wq), const_spec(bq),
                const_spec(wk), const_spec(bk),
                const_spec(wv), const_spec(bv),
                const_spec(wo), const_spec(bo),
                const_spec(wg_q), const_spec(wg_a), const_spec(bg),
            ],
            out_specs=[out_tile_spec, out_tile_spec],
            scratch_shapes=[
                pltpu.VMEM((n_heads, S, d_kv), dt),       # K, head-major
                pltpu.VMEM((n_heads, S, d_kv), dt),       # V, head-major
                pltpu.VMEM((n_heads, q_tile, d_kv), dt),  # Q, head-major (scaled)
                pltpu.VMEM((q_tile, inner), dt),          # ctx slab
            ]),
        compiler_params=pltpu.CompilerParams(
            # batch axis is megacore-parallel; the query-tile axis must stay
            # "arbitrary" because the K/V scratch is reused across query tiles.
            dimension_semantics=("parallel", "arbitrary"),
            vmem_limit_bytes=48 * 1024 * 1024),
    )(hidden_states,
      wq, bq, wk, bk, wv, bv, wo, bo, wg_q, wg_a, bg)

    present_key_value_state = None   # is_decoder/use_cache not exercised
    return out, present_key_value_state, (alpha,)


def attention_with_gate_reference(x, params, *, n_heads, d_kv):
    """Plain-JAX reference mirroring the PyTorch forward (eval mode)."""
    B, S, D = x.shape
    inner = n_heads * d_kv
    q = x @ params["wq"] + params["bq"]
    k = x @ params["wk"] + params["bk"]
    v = x @ params["wv"] + params["bv"]

    def shape(t):
        return t.reshape(B, S, n_heads, d_kv).transpose(0, 2, 1, 3)

    qh, kh, vh = shape(q), shape(k), shape(v)
    scores = jnp.einsum("bhqd,bhkd->bhqk", qh, kh) / math.sqrt(d_kv)
    attn = jax.nn.softmax(scores.astype(jnp.float32), axis=-1).astype(scores.dtype)
    ctx = jnp.einsum("bhqk,bhkd->bhqd", attn, vh)
    ctx = ctx.transpose(0, 2, 1, 3).reshape(B, S, inner)
    attn_out = ctx @ params["wo"] + params["bo"]
    gate_in = jnp.concatenate([q, attn_out], axis=-1)
    alpha = jax.nn.sigmoid(gate_in @ params["wg"] + params["bg"])
    return attn_out * alpha, alpha


def init_params(key, d_model, n_heads, d_kv):
    inner = n_heads * d_kv
    ks = jax.random.split(key, 10)

    def lin(kw, kb, fan_in, fan_out):
        bound = 1.0 / math.sqrt(fan_in)
        w = jax.random.uniform(kw, (fan_in, fan_out), jnp.float32, -bound, bound)
        b = jax.random.uniform(kb, (fan_out,), jnp.float32, -bound, bound)
        return w, b

    p = {}
    p["wq"], p["bq"] = lin(ks[0], ks[1], d_model, inner)
    p["wk"], p["bk"] = lin(ks[2], ks[3], d_model, inner)
    p["wv"], p["bv"] = lin(ks[4], ks[5], d_model, inner)
    p["wo"], p["bo"] = lin(ks[6], ks[7], inner, d_model)
    p["wg"], p["bg"] = lin(ks[8], ks[9], d_model + d_model, d_model)
    return p


if __name__ == "__main__":
    B, S, D = 2, 8, 32
    n_heads, d_kv = 4, 8          # inner_dim = 32 = d_model

    key = jax.random.PRNGKey(0)
    k_x, k_p = jax.random.split(key)
    x = jax.random.normal(k_x, (B, S, D), dtype=jnp.float32)
    params = init_params(k_p, D, n_heads, d_kv)

    out, present, (alpha,) = attention_with_gate(x, params, n_heads=n_heads, d_kv=d_kv)
    out = jax.block_until_ready(out)
    alpha = jax.block_until_ready(alpha)

    ref_out, ref_alpha = attention_with_gate_reference(x, params, n_heads=n_heads, d_kv=d_kv)
    # tolerance accounts for the EUP approximate reciprocal in the softmax denom
    assert jnp.allclose(out, ref_out, atol=2e-3, rtol=2e-3), "output mismatch"
    assert jnp.allclose(alpha, ref_alpha, atol=2e-3, rtol=2e-3), "alpha mismatch"

    print("KERNEL_OK")
</pallas_src>

<mosaic_0001>
module attributes {stable_mosaic.version = 11 : i64} {
  func.func @_attention_gate_kernel(%arg0: i32, %arg1: i32, %arg2: memref<1x8x32xf32, #tpu.memory_space<vmem>>, %arg3: memref<32x32xf32, #tpu.memory_space<vmem>>, %arg4: memref<1x32xf32, #tpu.memory_space<vmem>>, %arg5: memref<32x32xf32, #tpu.memory_space<vmem>>, %arg6: memref<1x32xf32, #tpu.memory_space<vmem>>, %arg7: memref<32x32xf32, #tpu.memory_space<vmem>>, %arg8: memref<1x32xf32, #tpu.memory_space<vmem>>, %arg9: memref<32x32xf32, #tpu.memory_space<vmem>>, %arg10: memref<1x32xf32, #tpu.memory_space<vmem>>, %arg11: memref<32x32xf32, #tpu.memory_space<vmem>>, %arg12: memref<32x32xf32, #tpu.memory_space<vmem>>, %arg13: memref<1x32xf32, #tpu.memory_space<vmem>>, %arg14: memref<1x8x32xf32, #tpu.memory_space<vmem>>, %arg15: memref<1x8x32xf32, #tpu.memory_space<vmem>>, %arg16: memref<4x8x8xf32, #tpu.memory_space<vmem>>, %arg17: memref<4x8x8xf32, #tpu.memory_space<vmem>>, %arg18: memref<4x8x8xf32, #tpu.memory_space<vmem>>, %arg19: memref<8x32xf32, #tpu.memory_space<vmem>>) attributes {dimension_semantics = [#tpu.dimension_semantics<parallel>, #tpu.dimension_semantics<arbitrary>], iteration_bounds = array<i64: 2, 1>, scalar_prefetch = 0 : i64, scratch_operands = 4 : i64, tpu.core_type = #tpu.core_type<tc>, window_params = [{transform_indices = @transform_0, window_bounds = array<i64: 1, 8, 32>}, {pipeline_mode = #tpu.pipeline_mode<synchronous>, transform_indices = @transform_1, window_bounds = array<i64: 32, 32>}, {pipeline_mode = #tpu.pipeline_mode<synchronous>, transform_indices = @transform_2, window_bounds = array<i64: 1, 32>}, {pipeline_mode = #tpu.pipeline_mode<synchronous>, transform_indices = @transform_3, window_bounds = array<i64: 32, 32>}, {pipeline_mode = #tpu.pipeline_mode<synchronous>, transform_indices = @transform_4, window_bounds = array<i64: 1, 32>}, {pipeline_mode = #tpu.pipeline_mode<synchronous>, transform_indices = @transform_5, window_bounds = array<i64: 32, 32>}, {pipeline_mode = #tpu.pipeline_mode<synchronous>, transform_indices = @transform_6, window_bounds = array<i64: 1, 32>}, {pipeline_mode = #tpu.pipeline_mode<synchronous>, transform_indices = @transform_7, window_bounds = array<i64: 32, 32>}, {pipeline_mode = #tpu.pipeline_mode<synchronous>, transform_indices = @transform_8, window_bounds = array<i64: 1, 32>}, {pipeline_mode = #tpu.pipeline_mode<synchronous>, transform_indices = @transform_9, window_bounds = array<i64: 32, 32>}, {pipeline_mode = #tpu.pipeline_mode<synchronous>, transform_indices = @transform_10, window_bounds = array<i64: 32, 32>}, {pipeline_mode = #tpu.pipeline_mode<synchronous>, transform_indices = @transform_11, window_bounds = array<i64: 1, 32>}, {transform_indices = @transform_12, window_bounds = array<i64: 1, 8, 32>}, {transform_indices = @transform_13, window_bounds = array<i64: 1, 8, 32>}]} {
    %c0_i32 = arith.constant 0 : i32
    %0 = arith.cmpi eq, %arg1, %c0_i32 : i32
    %1 = arith.extui %0 : i1 to i32
    %c0_i32_0 = arith.constant 0 : i32
    %2 = arith.cmpi ne, %1, %c0_i32_0 : i32
    scf.if %2 {
      %c0_56 = arith.constant 0 : index
      %c0_57 = arith.constant 0 : index
      %c0_58 = arith.constant 0 : index
      %90 = vector.load %arg2[%c0_56, %c0_57, %c0_58] : memref<1x8x32xf32, #tpu.memory_space<vmem>>, vector<1x8x32xf32>
      %91 = vector.shape_cast %90 : vector<1x8x32xf32> to vector<8x32xf32>
      %c0_59 = arith.constant 0 : index
      %c0_60 = arith.constant 0 : index
      %92 = vector.load %arg5[%c0_59, %c0_60] : memref<32x32xf32, #tpu.memory_space<vmem>>, vector<32x32xf32>
      %cst_61 = arith.constant dense<0.000000e+00> : vector<8x32xf32>
      %93 = tpu.matmul %91, %92, %cst_61 {dimension_numbers = #tpu.dot_dimension_numbers<[1], [0], [0], [1], [0, 0, 1, 1], [], []>} : vector<8x32xf32>, vector<32x32xf32>, vector<8x32xf32> -> vector<8x32xf32>
      %c0_62 = arith.constant 0 : index
      %c0_63 = arith.constant 0 : index
      %94 = vector.load %arg6[%c0_62, %c0_63] : memref<1x32xf32, #tpu.memory_space<vmem>>, vector<1x32xf32>
      %95 = vector.shape_cast %94 : vector<1x32xf32> to vector<32xf32>
      %96 = vector.shape_cast %95 : vector<32xf32> to vector<1x32xf32>
      %97 = vector.broadcast %96 : vector<1x32xf32> to vector<8x32xf32>
      %98 = arith.addf %93, %97 : vector<8x32xf32>
      %c0_64 = arith.constant 0 : index
      %c0_65 = arith.constant 0 : index
      %99 = vector.load %arg7[%c0_64, %c0_65] : memref<32x32xf32, #tpu.memory_space<vmem>>, vector<32x32xf32>
      %cst_66 = arith.constant dense<0.000000e+00> : vector<8x32xf32>
      %100 = tpu.matmul %91, %99, %cst_66 {dimension_numbers = #tpu.dot_dimension_numbers<[1], [0], [0], [1], [0, 0, 1, 1], [], []>} : vector<8x32xf32>, vector<32x32xf32>, vector<8x32xf32> -> vector<8x32xf32>
      %c0_67 = arith.constant 0 : index
      %c0_68 = arith.constant 0 : index
      %101 = vector.load %arg8[%c0_67, %c0_68] : memref<1x32xf32, #tpu.memory_space<vmem>>, vector<1x32xf32>
      %102 = vector.shape_cast %101 : vector<1x32xf32> to vector<32xf32>
      %103 = vector.shape_cast %102 : vector<32xf32> to vector<1x32xf32>
      %104 = vector.broadcast %103 : vector<1x32xf32> to vector<8x32xf32>
      %105 = arith.addf %100, %104 : vector<8x32xf32>
      %106 = vector.extract_strided_slice %98 {offsets = [0, 0], sizes = [8, 8], strides = [1, 1]} : vector<8x32xf32> to vector<8x8xf32>
      %c0_69 = arith.constant 0 : index
      %c0_70 = arith.constant 0 : index
      %c0_71 = arith.constant 0 : index
      %107 = vector.load %arg16[%c0_69, %c0_70, %c0_71] : memref<4x8x8xf32, #tpu.memory_space<vmem>>, vector<1x8x8xf32>
      %108 = vector.shape_cast %107 : vector<1x8x8xf32> to vector<8x8xf32>
      %109 = vector.shape_cast %106 : vector<8x8xf32> to vector<1x8x8xf32>
      tpu.vector_store %arg16[%c0_69, %c0_70, %c0_71], %109 {strides = array<i32>} : memref<4x8x8xf32, #tpu.memory_space<vmem>>, vector<1x8x8xf32>,
      %110 = vector.extract_strided_slice %105 {offsets = [0, 0], sizes = [8, 8], strides = [1, 1]} : vector<8x32xf32> to vector<8x8xf32>
      %c0_72 = arith.constant 0 : index
      %c0_73 = arith.constant 0 : index
      %c0_74 = arith.constant 0 : index
      %111 = vector.load %arg17[%c0_72, %c0_73, %c0_74] : memref<4x8x8xf32, #tpu.memory_space<vmem>>, vector<1x8x8xf32>
      %112 = vector.shape_cast %111 : vector<1x8x8xf32> to vector<8x8xf32>
      %113 = vector.shape_cast %110 : vector<8x8xf32> to vector<1x8x8xf32>
      tpu.vector_store %arg17[%c0_72, %c0_73, %c0_74], %113 {strides = array<i32>} : memref<4x8x8xf32, #tpu.memory_space<vmem>>, vector<1x8x8xf32>,
      %114 = vector.extract_strided_slice %98 {offsets = [0, 8], sizes = [8, 8], strides = [1, 1]} : vector<8x32xf32> to vector<8x8xf32>
      %c1_75 = arith.constant 1 : index
      %c0_76 = arith.constant 0 : index
      %c0_77 = arith.constant 0 : index
      %115 = vector.load %arg16[%c1_75, %c0_76, %c0_77] : memref<4x8x8xf32, #tpu.memory_space<vmem>>, vector<1x8x8xf32>
      %116 = vector.shape_cast %115 : vector<1x8x8xf32> to vector<8x8xf32>
      %117 = vector.shape_cast %114 : vector<8x8xf32> to vector<1x8x8xf32>
      tpu.vector_store %arg16[%c1_75, %c0_76, %c0_77], %117 {strides = array<i32>} : memref<4x8x8xf32, #tpu.memory_space<vmem>>, vector<1x8x8xf32>,
      %118 = vector.extract_strided_slice %105 {offsets = [0, 8], sizes = [8, 8], strides = [1, 1]} : vector<8x32xf32> to vector<8x8xf32>
      %c1_78 = arith.constant 1 : index
      %c0_79 = arith.constant 0 : index
      %c0_80 = arith.constant 0 : index
      %119 = vector.load %arg17[%c1_78, %c0_79, %c0_80] : memref<4x8x8xf32, #tpu.memory_space<vmem>>, vector<1x8x8xf32>
      %120 = vector.shape_cast %119 : vector<1x8x8xf32> to vector<8x8xf32>
      %121 = vector.shape_cast %118 : vector<8x8xf32> to vector<1x8x8xf32>
      tpu.vector_store %arg17[%c1_78, %c0_79, %c0_80], %121 {strides = array<i32>} : memref<4x8x8xf32, #tpu.memory_space<vmem>>, vector<1x8x8xf32>,
      %122 = vector.extract_strided_slice %98 {offsets = [0, 16], sizes = [8, 8], strides = [1, 1]} : vector<8x32xf32> to vector<8x8xf32>
      %c2_81 = arith.constant 2 : index
      %c0_82 = arith.constant 0 : index
      %c0_83 = arith.constant 0 : index
      %123 = vector.load %arg16[%c2_81, %c0_82, %c0_83] : memref<4x8x8xf32, #tpu.memory_space<vmem>>, vector<1x8x8xf32>
      %124 = vector.shape_cast %123 : vector<1x8x8xf32> to vector<8x8xf32>
      %125 = vector.shape_cast %122 : vector<8x8xf32> to vector<1x8x8xf32>
      tpu.vector_store %arg16[%c2_81, %c0_82, %c0_83], %125 {strides = array<i32>} : memref<4x8x8xf32, #tpu.memory_space<vmem>>, vector<1x8x8xf32>,
      %126 = vector.extract_strided_slice %105 {offsets = [0, 16], sizes = [8, 8], strides = [1, 1]} : vector<8x32xf32> to vector<8x8xf32>
      %c2_84 = arith.constant 2 : index
      %c0_85 = arith.constant 0 : index
      %c0_86 = arith.constant 0 : index
      %127 = vector.load %arg17[%c2_84, %c0_85, %c0_86] : memref<4x8x8xf32, #tpu.memory_space<vmem>>, vector<1x8x8xf32>
      %128 = vector.shape_cast %127 : vector<1x8x8xf32> to vector<8x8xf32>
      %129 = vector.shape_cast %126 : vector<8x8xf32> to vector<1x8x8xf32>
      tpu.vector_store %arg17[%c2_84, %c0_85, %c0_86], %129 {strides = array<i32>} : memref<4x8x8xf32, #tpu.memory_space<vmem>>, vector<1x8x8xf32>,
      %130 = vector.extract_strided_slice %98 {offsets = [0, 24], sizes = [8, 8], strides = [1, 1]} : vector<8x32xf32> to vector<8x8xf32>
      %c3_87 = arith.constant 3 : index
      %c0_88 = arith.constant 0 : index
      %c0_89 = arith.constant 0 : index
      %131 = vector.load %arg16[%c3_87, %c0_88, %c0_89] : memref<4x8x8xf32, #tpu.memory_space<vmem>>, vector<1x8x8xf32>
      %132 = vector.shape_cast %131 : vector<1x8x8xf32> to vector<8x8xf32>
      %133 = vector.shape_cast %130 : vector<8x8xf32> to vector<1x8x8xf32>
      tpu.vector_store %arg16[%c3_87, %c0_88, %c0_89], %133 {strides = array<i32>} : memref<4x8x8xf32, #tpu.memory_space<vmem>>, vector<1x8x8xf32>,
      %134 = vector.extract_strided_slice %105 {offsets = [0, 24], sizes = [8, 8], strides = [1, 1]} : vector<8x32xf32> to vector<8x8xf32>
      %c3_90 = arith.constant 3 : index
      %c0_91 = arith.constant 0 : index
      %c0_92 = arith.constant 0 : index
      %135 = vector.load %arg17[%c3_90, %c0_91, %c0_92] : memref<4x8x8xf32, #tpu.memory_space<vmem>>, vector<1x8x8xf32>
      %136 = vector.shape_cast %135 : vector<1x8x8xf32> to vector<8x8xf32>
      %137 = vector.shape_cast %134 : vector<8x8xf32> to vector<1x8x8xf32>
      tpu.vector_store %arg17[%c3_90, %c0_91, %c0_92], %137 {strides = array<i32>} : memref<4x8x8xf32, #tpu.memory_space<vmem>>, vector<1x8x8xf32>,
    } else {
    }
    %c8_i32 = arith.constant 8 : i32
    %3 = arith.muli %arg1, %c8_i32 : i32
    %4 = tpu.assume_multiple %3, 8 : i32
    %c0 = arith.constant 0 : index
    %5 = arith.index_cast %4 : i32 to index
    %c0_1 = arith.constant 0 : index
    %6 = vector.load %arg2[%c0, %5, %c0_1] : memref<1x8x32xf32, #tpu.memory_space<vmem>>, vector<1x8x32xf32>
    %7 = vector.shape_cast %6 : vector<1x8x32xf32> to vector<8x32xf32>
    %c0_2 = arith.constant 0 : index
    %c0_3 = arith.constant 0 : index
    %8 = vector.load %arg3[%c0_2, %c0_3] : memref<32x32xf32, #tpu.memory_space<vmem>>, vector<32x32xf32>
    %cst = arith.constant dense<0.000000e+00> : vector<8x32xf32>
    %9 = tpu.matmul %7, %8, %cst {dimension_numbers = #tpu.dot_dimension_numbers<[1], [0], [0], [1], [0, 0, 1, 1], [], []>} : vector<8x32xf32>, vector<32x32xf32>, vector<8x32xf32> -> vector<8x32xf32>
    %c0_4 = arith.constant 0 : index
    %c0_5 = arith.constant 0 : index
    %10 = vector.load %arg4[%c0_4, %c0_5] : memref<1x32xf32, #tpu.memory_space<vmem>>, vector<1x32xf32>
    %11 = vector.shape_cast %10 : vector<1x32xf32> to vector<32xf32>
    %12 = vector.shape_cast %11 : vector<32xf32> to vector<1x32xf32>
    %13 = vector.broadcast %12 : vector<1x32xf32> to vector<8x32xf32>
    %14 = arith.addf %9, %13 : vector<8x32xf32>
    %cst_6 = arith.constant 0.353553385 : f32
    %15 = vector.broadcast %cst_6 : f32 to vector<8x32xf32>
    %16 = arith.mulf %14, %15 : vector<8x32xf32>
    %17 = vector.extract_strided_slice %16 {offsets = [0, 0], sizes = [8, 8], strides = [1, 1]} : vector<8x32xf32> to vector<8x8xf32>
    %c0_7 = arith.constant 0 : index
    %c0_8 = arith.constant 0 : index
    %c0_9 = arith.constant 0 : index
    %18 = vector.load %arg18[%c0_7, %c0_8, %c0_9] : memref<4x8x8xf32, #tpu.memory_space<vmem>>, vector<1x8x8xf32>
    %19 = vector.shape_cast %18 : vector<1x8x8xf32> to vector<8x8xf32>
    %20 = vector.shape_cast %17 : vector<8x8xf32> to vector<1x8x8xf32>
    tpu.vector_store %arg18[%c0_7, %c0_8, %c0_9], %20 {strides = array<i32>} : memref<4x8x8xf32, #tpu.memory_space<vmem>>, vector<1x8x8xf32>,
    %21 = vector.extract_strided_slice %16 {offsets = [0, 8], sizes = [8, 8], strides = [1, 1]} : vector<8x32xf32> to vector<8x8xf32>
    %c1 = arith.constant 1 : index
    %c0_10 = arith.constant 0 : index
    %c0_11 = arith.constant 0 : index
    %22 = vector.load %arg18[%c1, %c0_10, %c0_11] : memref<4x8x8xf32, #tpu.memory_space<vmem>>, vector<1x8x8xf32>
    %23 = vector.shape_cast %22 : vector<1x8x8xf32> to vector<8x8xf32>
    %24 = vector.shape_cast %21 : vector<8x8xf32> to vector<1x8x8xf32>
    tpu.vector_store %arg18[%c1, %c0_10, %c0_11], %24 {strides = array<i32>} : memref<4x8x8xf32, #tpu.memory_space<vmem>>, vector<1x8x8xf32>,
    %25 = vector.extract_strided_slice %16 {offsets = [0, 16], sizes = [8, 8], strides = [1, 1]} : vector<8x32xf32> to vector<8x8xf32>
    %c2 = arith.constant 2 : index
    %c0_12 = arith.constant 0 : index
    %c0_13 = arith.constant 0 : index
    %26 = vector.load %arg18[%c2, %c0_12, %c0_13] : memref<4x8x8xf32, #tpu.memory_space<vmem>>, vector<1x8x8xf32>
    %27 = vector.shape_cast %26 : vector<1x8x8xf32> to vector<8x8xf32>
    %28 = vector.shape_cast %25 : vector<8x8xf32> to vector<1x8x8xf32>
    tpu.vector_store %arg18[%c2, %c0_12, %c0_13], %28 {strides = array<i32>} : memref<4x8x8xf32, #tpu.memory_space<vmem>>, vector<1x8x8xf32>,
    %29 = vector.extract_strided_slice %16 {offsets = [0, 24], sizes = [8, 8], strides = [1, 1]} : vector<8x32xf32> to vector<8x8xf32>
    %c3 = arith.constant 3 : index
    %c0_14 = arith.constant 0 : index
    %c0_15 = arith.constant 0 : index
    %30 = vector.load %arg18[%c3, %c0_14, %c0_15] : memref<4x8x8xf32, #tpu.memory_space<vmem>>, vector<1x8x8xf32>
    %31 = vector.shape_cast %30 : vector<1x8x8xf32> to vector<8x8xf32>
    %32 = vector.shape_cast %29 : vector<8x8xf32> to vector<1x8x8xf32>
    tpu.vector_store %arg18[%c3, %c0_14, %c0_15], %32 {strides = array<i32>} : memref<4x8x8xf32, #tpu.memory_space<vmem>>, vector<1x8x8xf32>,
    %c0_16 = arith.constant 0 : index
    %c0_17 = arith.constant 0 : index
    %c0_18 = arith.constant 0 : index
    %33 = vector.load %arg18[%c0_16, %c0_17, %c0_18] : memref<4x8x8xf32, #tpu.memory_space<vmem>>, vector<4x8x8xf32>
    %c0_19 = arith.constant 0 : index
    %c0_20 = arith.constant 0 : index
    %c0_21 = arith.constant 0 : index
    %34 = vector.load %arg16[%c0_19, %c0_20, %c0_21] : memref<4x8x8xf32, #tpu.memory_space<vmem>>, vector<4x8x8xf32>
    "tpu.trace_start"() <{level = 10 : i32, message = "hqd,hkd->hqk"}> : () -> ()
    %cst_22 = arith.constant dense<0.000000e+00> : vector<4x8x8xf32>
    %35 = tpu.matmul %33, %34, %cst_22 {dimension_numbers = #tpu.dot_dimension_numbers<[2], [2], [1], [1], [0, 0, 0, 1, 1, 1], [0], [0]>} : vector<4x8x8xf32>, vector<4x8x8xf32>, vector<4x8x8xf32> -> vector<4x8x8xf32>
    "tpu.trace_stop"() : () -> ()
    %cst_23 = arith.constant dense<0xFF800000> : vector<4x8xf32>
    %36 = vector.multi_reduction <maximumf>, %35, %cst_23 [2] : vector<4x8x8xf32> to vector<4x8xf32>
    %37 = vector.shape_cast %36 : vector<4x8xf32> to vector<4x8x1xf32>
    %38 = vector.broadcast %37 : vector<4x8x1xf32> to vector<4x8x8xf32>
    %39 = arith.subf %35, %38 : vector<4x8x8xf32>
    %40 = math.exp %39 : vector<4x8x8xf32>
    %cst_24 = arith.constant dense<0.000000e+00> : vector<4x8xf32>
    %41 = vector.multi_reduction <add>, %40, %cst_24 [2] : vector<4x8x8xf32> to vector<4x8xf32>
    %42 = vector.shape_cast %41 : vector<4x8xf32> to vector<4x8x1xf32>
    %43 = tpu.reciprocal %42 {approx = true} : vector<4x8x1xf32> -> vector<4x8x1xf32>
    %44 = vector.broadcast %43 : vector<4x8x1xf32> to vector<4x8x8xf32>
    %45 = arith.mulf %40, %44 : vector<4x8x8xf32>
    %c0_25 = arith.constant 0 : index
    %c0_26 = arith.constant 0 : index
    %c0_27 = arith.constant 0 : index
    %46 = vector.load %arg17[%c0_25, %c0_26, %c0_27] : memref<4x8x8xf32, #tpu.memory_space<vmem>>, vector<4x8x8xf32>
    "tpu.trace_start"() <{level = 10 : i32, message = "hqk,hkd->hqd"}> : () -> ()
    %cst_28 = arith.constant dense<0.000000e+00> : vector<4x8x8xf32>
    %47 = tpu.matmul %45, %46, %cst_28 {dimension_numbers = #tpu.dot_dimension_numbers<[2], [1], [1], [2], [0, 0, 0, 1, 1, 2], [0], [0]>} : vector<4x8x8xf32>, vector<4x8x8xf32>, vector<4x8x8xf32> -> vector<4x8x8xf32>
    "tpu.trace_stop"() : () -> ()
    %48 = vector.extract_strided_slice %47 {offsets = [0, 0, 0], sizes = [1, 8, 8], strides = [1, 1, 1]} : vector<4x8x8xf32> to vector<1x8x8xf32>
    %49 = vector.shape_cast %48 : vector<1x8x8xf32> to vector<8x8xf32>
    %c0_29 = arith.constant 0 : index
    %c0_30 = arith.constant 0 : index
    %50 = vector.load %arg19[%c0_29, %c0_30] : memref<8x32xf32, #tpu.memory_space<vmem>>, vector<8x8xf32>
    tpu.vector_store %arg19[%c0_29, %c0_30], %49 {strides = array<i32>} : memref<8x32xf32, #tpu.memory_space<vmem>>, vector<8x8xf32>,
    %51 = vector.extract_strided_slice %47 {offsets = [1, 0, 0], sizes = [1, 8, 8], strides = [1, 1, 1]} : vector<4x8x8xf32> to vector<1x8x8xf32>
    %52 = vector.shape_cast %51 : vector<1x8x8xf32> to vector<8x8xf32>
    %c0_31 = arith.constant 0 : index
    %c8 = arith.constant 8 : index
    %53 = vector.load %arg19[%c0_31, %c8] : memref<8x32xf32, #tpu.memory_space<vmem>>, vector<8x8xf32>
    tpu.vector_store %arg19[%c0_31, %c8], %52 {strides = array<i32>} : memref<8x32xf32, #tpu.memory_space<vmem>>, vector<8x8xf32>,
    %54 = vector.extract_strided_slice %47 {offsets = [2, 0, 0], sizes = [1, 8, 8], strides = [1, 1, 1]} : vector<4x8x8xf32> to vector<1x8x8xf32>
    %55 = vector.shape_cast %54 : vector<1x8x8xf32> to vector<8x8xf32>
    %c0_32 = arith.constant 0 : index
    %c16 = arith.constant 16 : index
    %56 = vector.load %arg19[%c0_32, %c16] : memref<8x32xf32, #tpu.memory_space<vmem>>, vector<8x8xf32>
    tpu.vector_store %arg19[%c0_32, %c16], %55 {strides = array<i32>} : memref<8x32xf32, #tpu.memory_space<vmem>>, vector<8x8xf32>,
    %57 = vector.extract_strided_slice %47 {offsets = [3, 0, 0], sizes = [1, 8, 8], strides = [1, 1, 1]} : vector<4x8x8xf32> to vector<1x8x8xf32>
    %58 = vector.shape_cast %57 : vector<1x8x8xf32> to vector<8x8xf32>
    %c0_33 = arith.constant 0 : index
    %c24 = arith.constant 24 : index
    %59 = vector.load %arg19[%c0_33, %c24] : memref<8x32xf32, #tpu.memory_space<vmem>>, vector<8x8xf32>
    tpu.vector_store %arg19[%c0_33, %c24], %58 {strides = array<i32>} : memref<8x32xf32, #tpu.memory_space<vmem>>, vector<8x8xf32>,
    %c0_34 = arith.constant 0 : index
    %c0_35 = arith.constant 0 : index
    %60 = vector.load %arg19[%c0_34, %c0_35] : memref<8x32xf32, #tpu.memory_space<vmem>>, vector<8x32xf32>
    %c0_36 = arith.constant 0 : index
    %c0_37 = arith.constant 0 : index
    %61 = vector.load %arg9[%c0_36, %c0_37] : memref<32x32xf32, #tpu.memory_space<vmem>>, vector<32x32xf32>
    %cst_38 = arith.constant dense<0.000000e+00> : vector<8x32xf32>
    %62 = tpu.matmul %60, %61, %cst_38 {dimension_numbers = #tpu.dot_dimension_numbers<[1], [0], [0], [1], [0, 0, 1, 1], [], []>} : vector<8x32xf32>, vector<32x32xf32>, vector<8x32xf32> -> vector<8x32xf32>
    %c0_39 = arith.constant 0 : index
    %c0_40 = arith.constant 0 : index
    %63 = vector.load %arg10[%c0_39, %c0_40] : memref<1x32xf32, #tpu.memory_space<vmem>>, vector<1x32xf32>
    %64 = vector.shape_cast %63 : vector<1x32xf32> to vector<32xf32>
    %65 = vector.shape_cast %64 : vector<32xf32> to vector<1x32xf32>
    %66 = vector.broadcast %65 : vector<1x32xf32> to vector<8x32xf32>
    %67 = arith.addf %62, %66 : vector<8x32xf32>
    %c0_41 = arith.constant 0 : index
    %c0_42 = arith.constant 0 : index
    %68 = vector.load %arg11[%c0_41, %c0_42] : memref<32x32xf32, #tpu.memory_space<vmem>>, vector<32x32xf32>
    %cst_43 = arith.constant dense<0.000000e+00> : vector<8x32xf32>
    %69 = tpu.matmul %14, %68, %cst_43 {dimension_numbers = #tpu.dot_dimension_numbers<[1], [0], [0], [1], [0, 0, 1, 1], [], []>} : vector<8x32xf32>, vector<32x32xf32>, vector<8x32xf32> -> vector<8x32xf32>
    %c0_44 = arith.constant 0 : index
    %c0_45 = arith.constant 0 : index
    %70 = vector.load %arg12[%c0_44, %c0_45] : memref<32x32xf32, #tpu.memory_space<vmem>>, vector<32x32xf32>
    %cst_46 = arith.constant dense<0.000000e+00> : vector<8x32xf32>
    %71 = tpu.matmul %67, %70, %cst_46 {dimension_numbers = #tpu.dot_dimension_numbers<[1], [0], [0], [1], [0, 0, 1, 1], [], []>} : vector<8x32xf32>, vector<32x32xf32>, vector<8x32xf32> -> vector<8x32xf32>
    %72 = arith.addf %69, %71 : vector<8x32xf32>
    %c0_47 = arith.constant 0 : index
    %c0_48 = arith.constant 0 : index
    %73 = vector.load %arg13[%c0_47, %c0_48] : memref<1x32xf32, #tpu.memory_space<vmem>>, vector<1x32xf32>
    %74 = vector.shape_cast %73 : vector<1x32xf32> to vector<32xf32>
    %75 = vector.shape_cast %74 : vector<32xf32> to vector<1x32xf32>
    %76 = vector.broadcast %75 : vector<1x32xf32> to vector<8x32xf32>
    %77 = arith.addf %72, %76 : vector<8x32xf32>
    %78 = arith.negf %77 : vector<8x32xf32>
    %79 = math.exp %78 : vector<8x32xf32>
    %cst_49 = arith.constant 1.000000e+00 : f32
    %80 = vector.broadcast %cst_49 : f32 to vector<8x32xf32>
    %81 = arith.addf %80, %79 : vector<8x32xf32>
    %82 = arith.divf %80, %81 : vector<8x32xf32>
    %83 = arith.mulf %67, %82 : vector<8x32xf32>
    %c0_50 = arith.constant 0 : index
    %c0_51 = arith.constant 0 : index
    %c0_52 = arith.constant 0 : index
    %84 = vector.load %arg14[%c0_50, %c0_51, %c0_52] : memref<1x8x32xf32, #tpu.memory_space<vmem>>, vector<1x8x32xf32>
    %85 = vector.shape_cast %84 : vector<1x8x32xf32> to vector<8x32xf32>
    %86 = vector.shape_cast %83 : vector<8x32xf32> to vector<1x8x32xf32>
    tpu.vector_store %arg14[%c0_50, %c0_51, %c0_52], %86 {strides = array<i32>} : memref<1x8x32xf32, #tpu.memory_space<vmem>>, vector<1x8x32xf32>,
    %c0_53 = arith.constant 0 : index
    %c0_54 = arith.constant 0 : index
    %c0_55 = arith.constant 0 : index
    %87 = vector.load %arg15[%c0_53, %c0_54, %c0_55] : memref<1x8x32xf32, #tpu.memory_space<vmem>>, vector<1x8x32xf32>
    %88 = vector.shape_cast %87 : vector<1x8x32xf32> to vector<8x32xf32>
    %89 = vector.shape_cast %82 : vector<8x32xf32> to vector<1x8x32xf32>
    tpu.vector_store %arg15[%c0_53, %c0_54, %c0_55], %89 {strides = array<i32>} : memref<1x8x32xf32, #tpu.memory_space<vmem>>, vector<1x8x32xf32>,
    return
  }
  func.func @transform_0(%arg0: i32, %arg1: i32) -> (i32, i32, i32) {
    %c0_i32 = arith.constant 0 : i32
    %c0_i32_0 = arith.constant 0 : i32
    %c0_i32_1 = arith.constant 0 : i32
    return %arg0, %c0_i32, %c0_i32_0 : i32, i32, i32
  }
  func.func @transform_1(%arg0: i32, %arg1: i32) -> (i32, i32) {
    %c0_i32 = arith.constant 0 : i32
    %c0_i32_0 = arith.constant 0 : i32
    %c0_i32_1 = arith.constant 0 : i32
    return %c0_i32, %c0_i32_0 : i32, i32
  }
  func.func @transform_2(%arg0: i32, %arg1: i32) -> (i32, i32) {
    %c0_i32 = arith.constant 0 : i32
    %c0_i32_0 = arith.constant 0 : i32
    %c0_i32_1 = arith.constant 0 : i32
    return %c0_i32, %c0_i32_0 : i32, i32
  }
  func.func @transform_3(%arg0: i32, %arg1: i32) -> (i32, i32) {
    %c0_i32 = arith.constant 0 : i32
    %c0_i32_0 = arith.constant 0 : i32
    %c0_i32_1 = arith.constant 0 : i32
    return %c0_i32, %c0_i32_0 : i32, i32
  }
  func.func @transform_4(%arg0: i32, %arg1: i32) -> (i32, i32) {
    %c0_i32 = arith.constant 0 : i32
    %c0_i32_0 = arith.constant 0 : i32
    %c0_i32_1 = arith.constant 0 : i32
    return %c0_i32, %c0_i32_0 : i32, i32
  }
  func.func @transform_5(%arg0: i32, %arg1: i32) -> (i32, i32) {
    %c0_i32 = arith.constant 0 : i32
    %c0_i32_0 = arith.constant 0 : i32
    %c0_i32_1 = arith.constant 0 : i32
    return %c0_i32, %c0_i32_0 : i32, i32
  }
  func.func @transform_6(%arg0: i32, %arg1: i32) -> (i32, i32) {
    %c0_i32 = arith.constant 0 : i32
    %c0_i32_0 = arith.constant 0 : i32
    %c0_i32_1 = arith.constant 0 : i32
    return %c0_i32, %c0_i32_0 : i32, i32
  }
  func.func @transform_7(%arg0: i32, %arg1: i32) -> (i32, i32) {
    %c0_i32 = arith.constant 0 : i32
    %c0_i32_0 = arith.constant 0 : i32
    %c0_i32_1 = arith.constant 0 : i32
    return %c0_i32, %c0_i32_0 : i32, i32
  }
  func.func @transform_8(%arg0: i32, %arg1: i32) -> (i32, i32) {
    %c0_i32 = arith.constant 0 : i32
    %c0_i32_0 = arith.constant 0 : i32
    %c0_i32_1 = arith.constant 0 : i32
    return %c0_i32, %c0_i32_0 : i32, i32
  }
  func.func @transform_9(%arg0: i32, %arg1: i32) -> (i32, i32) {
    %c0_i32 = arith.constant 0 : i32
    %c0_i32_0 = arith.constant 0 : i32
    %c0_i32_1 = arith.constant 0 : i32
    return %c0_i32, %c0_i32_0 : i32, i32
  }
  func.func @transform_10(%arg0: i32, %arg1: i32) -> (i32, i32) {
    %c0_i32 = arith.constant 0 : i32
    %c0_i32_0 = arith.constant 0 : i32
    %c0_i32_1 = arith.constant 0 : i32
    return %c0_i32, %c0_i32_0 : i32, i32
  }
  func.func @transform_11(%arg0: i32, %arg1: i32) -> (i32, i32) {
    %c0_i32 = arith.constant 0 : i32
    %c0_i32_0 = arith.constant 0 : i32
    %c0_i32_1 = arith.constant 0 : i32
    return %c0_i32, %c0_i32_0 : i32, i32
  }
  func.func @transform_12(%arg0: i32, %arg1: i32) -> (i32, i32, i32) {
    %c0_i32 = arith.constant 0 : i32
    %c0_i32_0 = arith.constant 0 : i32
    return %arg0, %arg1, %c0_i32 : i32, i32, i32
  }
  func.func @transform_13(%arg0: i32, %arg1: i32) -> (i32, i32, i32) {
    %c0_i32 = arith.constant 0 : i32
    %c0_i32_0 = arith.constant 0 : i32
    return %arg0, %arg1, %c0_i32 : i32, i32, i32
  }
}

</mosaic_0001>

<bundles_post_ra>
// kernel: tpu_custom_call.1
= control target key start
LH: loop header
LB: loop body
LE: loop exit
PB: predicated region body
PF: predicated region fallthrough
CT: control target
= control target key end

     0   :  { %s3437_s0 = inlined_call_operand.hbm [shape: f32[2,8,32], index: 0, kind: input, shape index: {}]   ;;  %s3438_s1 = inlined_call_operand.hbm [shape: f32[32,32], index: 1, kind: input, shape index: {}]   ;;  %s3439_s2 = inlined_call_operand.vmem [shape: f32[1,32], index: 2, kind: input, shape index: {}]   ;;  %s3440_s3 = inlined_call_operand.hbm [shape: f32[32,32], index: 3, kind: input, shape index: {}]   ;;  %s3441_s4 = inlined_call_operand.vmem [shape: f32[1,32], index: 4, kind: input, shape index: {}]   ;;  %s3442_s5 = inlined_call_operand.hbm [shape: f32[32,32], index: 5, kind: input, shape index: {}]   ;;  %s3443_s6 = inlined_call_operand.hbm [shape: f32[1,32], index: 6, kind: input, shape index: {}]   ;;  %s3444_s7 = inlined_call_operand.hbm [shape: f32[32,32], index: 7, kind: input, shape index: {}]   ;;  %s3445_s8 = inlined_call_operand.hbm [shape: f32[1,32], index: 8, kind: input, shape index: {}]   ;;  %s3446_s9 = inlined_call_operand.vmem [shape: f32[32,32], index: 9, kind: input, shape index: {}]   ;;  %s3447_s10 = inlined_call_operand.hbm [shape: f32[32,32], index: 10, kind: input, shape index: {}]   ;;  %s3448_s11 = inlined_call_operand.vmem [shape: f32[1,32], index: 11, kind: input, shape index: {}]   ;;  %s3449_s12 = inlined_call_operand.hbm [shape: f32[2,8,32], index: 12, kind: output, shape index: {0}]   ;;  %s3450_s13 = inlined_call_operand.hbm [shape: f32[2,8,32], index: 13, kind: output, shape index: {1}]  }
   0x1   :  { %3460 = sst [smem:[#allocation31_spill]] %s3437_s0 }
   0x2   :  { %3461 = sst [smem:[#allocation32_spill]] %s3438_s1 }
   0x3   :  { %3462 = sst [smem:[#allocation33_spill]] %s3439_s2 }
   0x4   :  { %3463 = sst [smem:[#allocation34_spill]] %s3440_s3 }
   0x5   :  { %3464 = sst [smem:[#allocation35_spill]] %s3441_s4 }
   0x6   :  { %3465 = sst [smem:[#allocation36_spill]] %s3442_s5 }
   0x7   :  { %3466 = sst [smem:[#allocation37_spill]] %s3446_s9 }
   0x8   :  { %3467 = sst [smem:[#allocation38_spill]] %s3448_s11 }
   0x9   :  { %3468 = sst [smem:[#allocation39_spill]] %s3449_s12 }
   0xa   :  { %3469 = sst [smem:[#allocation40_spill]] %s3450_s13 }
   0xb   :  { %19 = vsyncpa [#allocation7], 0 }
   0xc   :  { %21 = vsyncpa [#allocation7 + $0x1], 0 }
   0xd   :  { %22 = vsyncpa [#allocation10], 0 }
   0xe   :  { %23 = vsyncpa [#allocation13], 0 }
   0xf   :  { %24 = vsyncpa [#allocation16], 0 }
  0x10   :  { %25 = vsyncpa [#allocation19], 0 }
  0x11   :  { %26 = vsyncpa [#allocation8], 0 }
  0x12   :  { %28 = vsyncpa [#allocation8 + $0x1], 0 }
  0x13   :  { %29 = vsyncpa [#allocation22], 0 }
  0x14   :  { %31 = vsyncpa [#allocation22 + $0x1], 0  ;;  %s2896_s25 = smov 0   ;;  %s2898_s26 = smov 0  }
  0x15   :  { %s2900_s27 = smov 0   ;;  %s2902_s28 = smov 0  }
  0x16   :  { %s2904_s29 = smov 0   ;;  %s2906_s30 = smov 0  }
  0x17 LB: > { %3470 = sst [smem:[#allocation30_spill]] %s2795_s28  ;;  %s3451_s14 = sadd.s32 4294967295, %s2803_s30   ;;  %s2803_s30 = sphi %s2906_s30, %s37_s30   ;;  %s2799_s29 = sphi %s2904_s29, %s3503_s29   ;;  %s2795_s28 = sphi %s2902_s28, %s3502_s28   ;;  %s2791_s27 = sphi %s2900_s27, %s3501_s27   ;;  %s2787_s26 = sphi %s2898_s26, %s3500_s26   ;;  %s2783_s25 = sphi %s2896_s25, %s3499_s25  }
  0x18   : > { %p2038_p0 = scmp.ge.s32.totalorder %s2803_s30, 1  ;;  %p2930_p1 = scmp.eq.s32.totalorder %s3451_s14, 0 }
  0x19   : > { %p367_p2 = scmp.lt.s32.totalorder %s2803_s30, 3  ;;  %s2805_s17 = smov [#allocation9]  }
  0x1a   : > { %s3471_s15 = scalar_select %p2930_p1, 1, 0 }
  0x1b   : > { %p2935_p3 = pnand %p2038_p0, %p367_p2  ;;  %s379_s18 = sshll.u32 %s2805_s17, 4  ;;  %s2939_s18 = int_to_ptr.vmem [resolvable:$true] %s379_s18 }
  0x1c   : > { %s2806_s20 = smov [#allocation12]   ;;  %s2807_s22 = smov [#allocation15]  }
  0x1d   : > { %s3472_s16 = scalar_select %p2935_p3, 1, 0 }
  0x1e   : > { %p2312_p4 = pneg %p2935_p3  ;;  %s411_s21 = sshll.u32 %s2806_s20, 4  ;;  %s2950_s21 = int_to_ptr.vmem [resolvable:$true] %s411_s21 }
  0x1f   : > { %s2952_s23 = sshll.u32 %s2807_s22, 4  ;;  %s3474_s1 = sld [smem:[#allocation32_spill]]  ;;  %s436_s23 = int_to_ptr.vmem [resolvable:$true] %s2952_s23 }
  0x20   : > { %p2946_p6 = pnand %p2312_p4, %p2930_p1 }
  0x22   : > { %p2962_p8 = pneg %p2946_p6 }
  0x25   : > { %s2447_s14 = scalar_lea.hbm %s3474_s1, 512 }
  0x26   : > { %p2448_p7 = scmp.ne.s32.totalorder %s3474_s1, %s2447_s14  ;;  %p2454_p11 = scmp.lt.u32.totalorder %s2447_s14, %s3474_s1 }
  0x28   : > { %p2450_p9 = pnand %p2962_p8, %p2448_p7 }
  0x2a   : > { %p2451_p10 = pneg %p2450_p9 }
  0x2c   : > { %p2456_p12 = pnand %p2454_p11, %p2451_p10 }
  0x2e   : > { %2459 = shalt.err (!%p2456_p12)
}
  0x2f   : > { %s2460_s12 = scalar_lea.vmem %s2939_s18, 512  ;;  %p2468_p4 = scmp.lt.s32.totalorder %s2939_s18, %s2939_s18 }
  0x30   : > { %p2461_p13 = scmp.ne.s32.totalorder %s2939_s18, %s2460_s12  ;;  %p2469_p5 = scmp.lt.s32.totalorder %s2460_s12, %s2460_s12 }
  0x32   : > { %p2463_p0 = pnand %p2461_p13, %p2962_p8  ;;  %p2470_p7 = por %p2469_p5, %p2468_p4 }
  0x34   : > { %p2464_p2 = pneg %p2463_p0 }
  0x36   : > { %p2471_p9 = pnand %p2470_p7, %p2464_p2 }
  0x38   : > { %2474 = shalt.err (!%p2471_p9)
}
  0x39   : > { %s2808_s13 = smov 128   ;;  %s2809_s14 = smov 8  }
  0x3a   : > { %2315 = dma.hbm_to_vmem [thread:$0]  (!%p2946_p6), %s3474_s1, 512, %s2939_s18, [#allocation10], %s2808_s13, %s2808_s13, %s2809_s14  }
  0x3b   : > { %s3476_s5 = sld [smem:[#allocation36_spill]] }
  0x41   : > { %s2475_s12 = scalar_lea.hbm %s3476_s5, 512 }
  0x42   : > { %p2476_p5 = scmp.ne.s32.totalorder %s3476_s5, %s2475_s12  ;;  %p2482_p12 = scmp.lt.u32.totalorder %s2475_s12, %s3476_s5 }
  0x44   : > { %p2478_p10 = pnand %p2476_p5, %p2962_p8 }
  0x46   : > { %p2479_p11 = pneg %p2478_p10 }
  0x48   : > { %p2484_p13 = pnand %p2482_p12, %p2479_p11 }
  0x4a   : > { %2487 = shalt.err (!%p2484_p13)
}
  0x4b   : > { %s2488_s18 = scalar_lea.vmem %s2950_s21, 512  ;;  %p2496_p7 = scmp.lt.s32.totalorder %s2950_s21, %s2950_s21 }
  0x4c   : > { %p2489_p0 = scmp.ne.s32.totalorder %s2950_s21, %s2488_s18  ;;  %p2497_p9 = scmp.lt.s32.totalorder %s2488_s18, %s2488_s18 }
  0x4e   : > { %p2491_p2 = pnand %p2489_p0, %p2962_p8  ;;  %p2498_p5 = por %p2497_p9, %p2496_p7 }
  0x50   : > { %p2492_p4 = pneg %p2491_p2 }
  0x52   : > { %p2499_p10 = pnand %p2498_p5, %p2492_p4 }
  0x54   : > { %2502 = shalt.err (!%p2499_p10)
}
  0x55   : > { %2321 = dma.hbm_to_vmem [thread:$0]  (!%p2946_p6), %s3476_s5, 512, %s2950_s21, [#allocation13], %s2808_s13, %s2808_s13, %s2809_s14  }
  0x56   : > { %s2503_s24 = scalar_lea.hbm %s3444_s7, 512 }
  0x57   : > { %p2504_p11 = scmp.ne.s32.totalorder %s3444_s7, %s2503_s24  ;;  %p2510_p0 = scmp.lt.u32.totalorder %s2503_s24, %s3444_s7 }
  0x59   : > { %p2506_p12 = pnand %p2504_p11, %p2962_p8 }
  0x5b   : > { %p2507_p13 = pneg %p2506_p12 }
  0x5d   : > { %p2512_p2 = pnand %p2510_p0, %p2507_p13 }
  0x5f   : > { %2515 = shalt.err (!%p2512_p2)
}
  0x60   : > { %s2516_s18 = scalar_lea.vmem %s436_s23, 512  ;;  %p2524_p5 = scmp.lt.s32.totalorder %s436_s23, %s436_s23 }
  0x61   : > { %p2517_p4 = scmp.ne.s32.totalorder %s436_s23, %s2516_s18  ;;  %p2525_p10 = scmp.lt.s32.totalorder %s2516_s18, %s2516_s18 }
  0x63   : > { %p2519_p7 = pnand %p2517_p4, %p2962_p8  ;;  %p2526_p3 = por %p2525_p10, %p2524_p5 }
  0x65   : > { %p2520_p9 = pneg %p2519_p7 }
  0x67   : > { %p2527_p1 = pnand %p2526_p3, %p2520_p9 }
  0x69   : > { %2530 = shalt.err (!%p2527_p1)
}
  0x6a   : > { %2327 = dma.hbm_to_vmem [thread:$0]  (!%p2946_p6), %s3444_s7, 512, %s436_s23, [#allocation16], %s2808_s13, %s2808_s13, %s2809_s14  }
  0x6b   : > { %s2810_s4 = smov [#allocation11]   ;;  %s2811_s28 = smov [#allocation14]  }
  0x6c   : > { %s395_s9 = sshll.u32 %s2810_s4, 4  ;;  %s425_s24 = sshll.u32 %s2811_s28, 4  ;;  %s396_s9 = int_to_ptr.vmem [resolvable:$true] %s395_s9  ;;  %s426_s24 = int_to_ptr.vmem [resolvable:$true] %s425_s24 }
  0x6d   : > { %s3477_s3 = sld [smem:[#allocation34_spill]] }
  0x73   : > { %s2531_s22 = scalar_lea.hbm %s3477_s3, 512 }
  0x74   : > { %p2532_p1 = scmp.ne.s32.totalorder %s3477_s3, %s2531_s22  ;;  %p2538_p12 = scmp.lt.u32.totalorder %s2531_s22, %s3477_s3 }
  0x76   : > { %p2534_p3 = pnand %p2532_p1, %p2962_p8 }
  0x78   : > { %p2535_p11 = pneg %p2534_p3 }
  0x7a   : > { %p2540_p13 = pnand %p2538_p12, %p2535_p11 }
  0x7c   : > { %2543 = shalt.err (!%p2540_p13)
}
  0x7d   : > { %s2544_s23 = scalar_lea.vmem %s396_s9, 512  ;;  %p2552_p7 = scmp.lt.s32.totalorder %s396_s9, %s396_s9 }
  0x7e   : > { %p2545_p0 = scmp.ne.s32.totalorder %s396_s9, %s2544_s23  ;;  %p2553_p9 = scmp.lt.s32.totalorder %s2544_s23, %s2544_s23 }
  0x80   : > { %p2547_p2 = pnand %p2545_p0, %p2962_p8  ;;  %p2554_p5 = por %p2553_p9, %p2552_p7 }
  0x82   : > { %p2548_p4 = pneg %p2547_p2 }
  0x84   : > { %p2555_p10 = pnand %p2554_p5, %p2548_p4 }
  0x86   : > { %2558 = shalt.err (!%p2555_p10)
}
  0x87   : > { %2318 = dma.hbm_to_vmem [thread:$0]  (!%p2946_p6), %s3477_s3, 512, %s396_s9, [#allocation10], %s2808_s13, %s2808_s13, %s2809_s14  }
  0x88   : > { %s2559_s17 = scalar_lea.hbm %s3443_s6, 16 }
  0x89   : > { %p2560_p1 = scmp.ne.s32.totalorder %s3443_s6, %s2559_s17  ;;  %p2566_p12 = scmp.lt.u32.totalorder %s2559_s17, %s3443_s6 }
  0x8b   : > { %p2562_p3 = pnand %p2560_p1, %p2962_p8 }
  0x8d   : > { %p2563_p11 = pneg %p2562_p3 }
  0x8f   : > { %p2568_p13 = pnand %p2566_p12, %p2563_p11 }
  0x91   : > { %2571 = shalt.err (!%p2568_p13)
}
  0x92   : > { %s2572_s21 = scalar_lea.vmem %s426_s24, 16  ;;  %s2579_s9 = scalar_lea.vmem %s426_s24, 32 }
  0x93   : > { %p2573_p0 = scmp.ne.s32.totalorder %s426_s24, %s2572_s21  ;;  %p2580_p7 = scmp.lt.s32.totalorder %s426_s24, %s426_s24 }
  0x94   : > { %p2581_p9 = scmp.lt.s32.totalorder %s2579_s9, %s2572_s21 }
  0x95   : > { %p2575_p2 = pnand %p2573_p0, %p2962_p8 }
  0x96   : > { %p2582_p5 = por %p2581_p9, %p2580_p7 }
  0x97   : > { %p2576_p4 = pneg %p2575_p2 }
  0x99   : > { %p2583_p10 = pnand %p2582_p5, %p2576_p4 }
  0x9b   : > { %2586 = shalt.err (!%p2583_p10)
}
  0x9c   : > { %2324 = dma.hbm_to_vmem [thread:$0]  (!%p2946_p6), %s3443_s6, 16, %s426_s24, [#allocation13]  }
  0x9d   : > { %s2812_s2 = smov [#allocation17]   ;;  %s2813_s28 = smov [#allocation18]  }
  0x9e   : > { %s449_s4 = sshll.u32 %s2812_s2, 4  ;;  %s462_s17 = sshll.u32 %s2813_s28, 4  ;;  %s450_s4 = int_to_ptr.vmem [resolvable:$true] %s449_s4  ;;  %s463_s17 = int_to_ptr.vmem [resolvable:$true] %s462_s17 }
  0x9f   : > { %s2587_s12 = scalar_lea.hbm %s3445_s8, 16 }
  0xa0   : > { %p2588_p1 = scmp.ne.s32.totalorder %s3445_s8, %s2587_s12  ;;  %p2594_p12 = scmp.lt.u32.totalorder %s2587_s12, %s3445_s8 }
  0xa2   : > { %p2590_p3 = pnand %p2588_p1, %p2962_p8 }
  0xa4   : > { %p2591_p11 = pneg %p2590_p3 }
  0xa6   : > { %p2596_p13 = pnand %p2594_p12, %p2591_p11 }
  0xa8   : > { %2599 = shalt.err (!%p2596_p13)
}
  0xa9   : > { %s2600_s24 = scalar_lea.vmem %s450_s4, 16  ;;  %s2607_s1 = scalar_lea.vmem %s450_s4, 32 }
  0xaa   : > { %p2601_p0 = scmp.ne.s32.totalorder %s450_s4, %s2600_s24  ;;  %p2608_p7 = scmp.lt.s32.totalorder %s450_s4, %s450_s4 }
  0xab   : > { %p2609_p9 = scmp.lt.s32.totalorder %s2607_s1, %s2600_s24 }
  0xac   : > { %p2603_p2 = pnand %p2601_p0, %p2962_p8 }
  0xad   : > { %p2610_p5 = por %p2609_p9, %p2608_p7 }
  0xae   : > { %p2604_p4 = pneg %p2603_p2 }
  0xb0   : > { %p2611_p10 = pnand %p2610_p5, %p2604_p4 }
  0xb2   : > { %2614 = shalt.err (!%p2611_p10)
}
  0xb3   : > { %2330 = dma.hbm_to_vmem [thread:$0]  (!%p2946_p6), %s3445_s8, 16, %s450_s4, [#allocation16]  }
  0xb4   : > { %s2615_s12 = scalar_lea.hbm %s3447_s10, 512 }
  0xb5   : > { %p2616_p1 = scmp.ne.s32.totalorder %s3447_s10, %s2615_s12  ;;  %p2622_p12 = scmp.lt.u32.totalorder %s2615_s12, %s3447_s10 }
  0xb7   : > { %p2618_p3 = pnand %p2616_p1, %p2962_p8 }
  0xb9   : > { %p2619_p11 = pneg %p2618_p3 }
  0xbb   : > { %p2624_p13 = pnand %p2622_p12, %p2619_p11 }
  0xbd   : > { %2627 = shalt.err (!%p2624_p13)
}
  0xbe   : > { %s2628_s24 = scalar_lea.vmem %s463_s17, 512  ;;  %p2636_p7 = scmp.lt.s32.totalorder %s463_s17, %s463_s17 }
  0xbf   : > { %p2629_p0 = scmp.ne.s32.totalorder %s463_s17, %s2628_s24  ;;  %p2637_p9 = scmp.lt.s32.totalorder %s2628_s24, %s2628_s24 }
  0xc1   : > { %p2631_p2 = pnand %p2629_p0, %p2962_p8  ;;  %p2638_p5 = por %p2637_p9, %p2636_p7 }
  0xc3   : > { %p2632_p4 = pneg %p2631_p2 }
  0xc5   : > { %p2639_p10 = pnand %p2638_p5, %p2632_p4 }
  0xc7   : > { %2642 = shalt.err (!%p2639_p10)
}
  0xc8   : > { %2333 = dma.hbm_to_vmem [thread:$0]  (!%p2946_p6), %s3447_s10, 512, %s463_s17, [#allocation19], %s2808_s13, %s2808_s13, %s2809_s14  }
  0xc9   : > { %s2037_s11 = sadd.s32 4294967294, %s2803_s30   ;;  %s49_s19 = sadd.s32 1, %s2799_s29 }
  0xca   : > { %s56_s2 = sadd.s32 1, %s2791_s27  ;;  %p51_p8 = scmp.ge.s32.totalorder %s49_s19, 2 }
  0xcb   : > { %p63_p1 = scmp.ne.s32.totalorder %s2791_s27, %s2787_s26  ;;  %p64_p3 = scmp.eq.s32.totalorder %s2803_s30, 0 }
  0xcc   : > { %p69_p11 = scmp.ne.s32.totalorder %s2787_s26, %s2783_s25  ;;  %s3505_s19 = smov (%p51_p8, %s49_s19), 0 }
  0xcd   : > { %p3122_p12 = por %p64_p3, %p63_p1  ;;  %p3479_p13 = scmp.ne.s32.totalorder %s3471_s15, 0 }
  0xce   : > { %s53_s14 = ssub.s32 %s2799_s29, %s3505_s19  ;;  %s3481_s17 = sadd.s32 4294967295, %s2803_s30  }
  0xcf   : > { %p3128_p6 = por %p3479_p13, %p69_p11  ;;  %p326_p0 = scmp.eq.s32.totalorder %s3481_s17, 1 }
  0xd0   : > { %p54_p2 = scmp.eq.s32.totalorder %s53_s14, 0  ;;  %p332_p4 = scmp.eq.s32.totalorder %s2037_s11, 1 }
  0xd1   : > { %p3136_p7 = por %p326_p0, %p63_p1  ;;  %p2352_p9 = scmp.lt.s32.totalorder %s2803_s30, 2 }
  0xd2   : > { %s3142_s22 = scalar_select %p54_p2, %s2791_s27, %s56_s2  }
  0xd3   : > { %s3482_s20 = scalar_select %p3136_p7, 1, 0 }
  0xd4   : > { %p3144_p5 = por %p332_p4, %p69_p11  ;;  %s479_s18 = sand.u32 1, %s2791_s27  }
  0xd5   : > { %s2047_s21 = sshll.u32 %s479_s18, 3  ;;  %s2048_s9 = sshll.u32 %s2799_s29, 7 }
  0xd6   : > { %s3483_s12 = scalar_select %p3144_p5, 1, 0 }
  0xd7   : > { %s3484_s0 = sld [smem:[#allocation31_spill]]  ;;  %s483_s1 = scalar_lea.vmem [#allocation6], %s2047_s21 }
  0xd8   : > { %s490_s11 = sshll.u32 %s483_s1, 4  ;;  %p3159_p10 = pnand %p2352_p9, %p3122_p12  ;;  %s3155_s11 = int_to_ptr.vmem [resolvable:$true] %s490_s11 }
  0xd9   : > { %s480_s14 = scalar_lea.sflag [#allocation7], %s479_s18 }
  0xda   : > { %p2645_p1 = pneg %p3159_p10 }
  0xdd   : > { %s3153_s4 = scalar_lea.hbm %s3484_s0, %s2048_s9  ;;  %s2648_s23 = scalar_lea.hbm %s3484_s0, 256 }
  0xde   : > { %s2643_s17 = scalar_lea.hbm %s3153_s4, 128  ;;  %p2649_p12 = scmp.lt.u32.totalorder %s3153_s4, %s3484_s0 }
  0xdf   : > { %p2644_p8 = scmp.ne.s32.totalorder %s3153_s4, %s2643_s17  ;;  %p2650_p13 = scmp.lt.u32.totalorder %s2648_s23, %s2643_s17 }
  0xe0   : > { %p2652_p2 = scmp.lt.u32.totalorder %s2643_s17, %s3153_s4 }
  0xe1   : > { %p2646_p3 = pnand %p2645_p1, %p2644_p8  ;;  %p2651_p0 = por %p2650_p13, %p2649_p12 }
  0xe3   : > { %p2647_p11 = pneg %p2646_p3  ;;  %p2653_p4 = por %p2652_p2, %p2651_p0 }
  0xe5   : > { %p2654_p9 = pnand %p2653_p4, %p2647_p11 }
  0xe7   : > { %2657 = shalt.err (!%p2654_p9)
}
  0xe8   : > { %s2658_s18 = scalar_lea.vmem %s3155_s11, 128  ;;  %s2814_s1 = smov [#allocation6]  }
  0xe9   : > { %p2659_p8 = scmp.ne.s32.totalorder %s3155_s11, %s2658_s18  ;;  %s2663_s21 = sshll.u32 %s2814_s1, 4  ;;  %s2664_s21 = int_to_ptr.vmem [resolvable:$false] %s2663_s21 }
  0xea   : > { %s2665_s9 = scalar_lea.vmem %s2664_s21, 256  ;;  %p2666_p7 = scmp.lt.s32.totalorder %s3155_s11, %s2664_s21 }
  0xeb   : > { %p2661_p3 = pnand %p2659_p8, %p2645_p1  ;;  %p2667_p12 = scmp.lt.s32.totalorder %s2665_s9, %s2658_s18 }
  0xed   : > { %p2662_p5 = pneg %p2661_p3  ;;  %p2668_p13 = por %p2667_p12, %p2666_p7 }
  0xef   : > { %p2669_p0 = pnand %p2668_p13, %p2662_p5 }
  0xf1   : > { %2672 = shalt.err (!%p2669_p0)
}
  0xf2   : > { %2337 = dma.hbm_to_vmem [thread:$0]  (!%p3159_p10), %s3153_s4, 128, %s3155_s11, %s480_s14  }
  0xf3   : > { %p3486_p11 = scmp.ne.s32.totalorder %s3472_s16, 0 }
  0xf4   : > { %s3191_s17 = sand.u32 (!%p3486_p11), 1, %s2787_s26  }
  0xf5   : > { %499 = sbr.rel (%p3486_p11) target bundleno = 1983 (0x7bf), region = 68  ;;  %s3194_s23 = sshll.u32 (!%p3486_p11), %s3191_s17, 3 }
  0xf6   : > { %s502_s28 = scalar_lea.sflag (!%p3486_p11), [#allocation7], %s3191_s17  ;;  %s505_s24 = scalar_lea.vmem (!%p3486_p11), [#allocation6], %s3194_s23 }
  0xfc   : > { %2754 = dma.done.wait (%p3128_p6), %s502_s28, 128  }
  0xfd   : > { %2756 = vsyncadd (%p3128_p6), %s502_s28, 4294967168  ;;  %p3487_p7 = scmp.ne.s32.totalorder %s3471_s15, 0 }
  0xff   : > { %2758 = dma.done.wait (%p3487_p7), [#allocation10], 1024  }
 0x100   : > { %2760 = vsyncadd (%p3487_p7), [#allocation10], 4294966272 }
 0x101   : > { %2762 = dma.done.wait (%p3487_p7), [#allocation13], 528  }
 0x102   : > { %2764 = vsyncadd (%p3487_p7), [#allocation13], 4294966768 }
 0x103   : > { %2766 = dma.done.wait (%p3487_p7), [#allocation16], 528  }
 0x104   : > { %2768 = vsyncadd (%p3487_p7), [#allocation16], 4294966768 }
 0x105   : > { %2770 = dma.done.wait (%p3487_p7), [#allocation19], 512  }
 0x106   : > { %2772 = vsyncadd (%p3487_p7), [#allocation19], 4294966784  ;;  %v2815_v0 = vmov 0.0|0.0   ;;  %vm2816_vm0 = vmmov 0   ;;  %v2817_v1 = vmov 0.0   ;;  %v586_v2 = vld [vmem:[#allocation11] sm:$0xff] }
 0x107   : > { %2242 = vmatprep.subr.bf16.mxu0 %v2815_v0  ;;  %2144 = vmatprep.mubr.msk.f32.mxu0 %vm2816_vm0, %v2817_v1  ;;  %v587_v3 = vld [vmem:[#allocation11 + $0x8] sm:$0xff]  ;;  %v588_v4 = vld [vmem:[#allocation11 + $0x10] sm:$0xff]  ;;  %v589_v6 = vld [vmem:[#allocation11 + $0x18] sm:$0xff]  ;;  %vm597_vm1 = vcmask 261120   ;;  %s3488_s13 = sld [smem:[#allocation35_spill]]  ;;  %vm752_vm2 = vcmask 64512  }
 0x108   : > { %2248 = vmatprep.subr.bf16.mxu1 %v2815_v0  ;;  %2155 = vmatprep.mubr.msk.f32.mxu1 %vm2816_vm0, %v2817_v1  ;;  %v2243_v5 = vpack.c.bf16 %v587_v3, %v586_v2  ;;  %v2246_v7 = vpack.c.bf16 %v589_v6, %v588_v4  ;;  %v671_v8 = vld [vmem:[#allocation12] sm:$0xff]  ;;  %v672_v9 = vld [vmem:[#allocation12 + $0x8] sm:$0xff]  ;;  %v585_v13 = vld [vmem:[%s505_s24] sm:$0xff]  ;;  %s2818_s4 = smov 112   ;;  %s2819_s11 = smov 120   ;;  %vm1551_vm3 = vcmask 130112  }
 0x109   : > { %v790_v10 = vld [vmem:[#allocation9] sm:$0xff]  ;;  %v791_v11 = vld [vmem:[#allocation9 + $0x8] sm:$0xff]  ;;  %v2249_v12 = vpack.c.bf16 %v672_v9, %v671_v8  ;;  %v792_v15 = vld [vmem:[#allocation9 + $0x10] sm:$0xff]  ;;  %s3489_s18 = sld [smem:[#allocation33_spill]]  ;;  %s2820_s1 = smov 104   ;;  %vm1557_vm4 = vcmask 195712  }
 0x10a   : > { %2244 = vmatpush3.bf16.msra.mxu0 %v2243_v5  ;;  %v2255_v14 = vpack.c.bf16 %v791_v11, %v790_v10  ;;  %v793_v16 = vld [vmem:[#allocation9 + $0x18] sm:$0xff]  ;;  %v673_v18 = vld [vmem:[#allocation12 + $0x10] sm:$0xff]  ;;  %v2062_v32 = vld [vmem:[#allocation14] ss:$0 sm:$0xff]  ;;  %s2821_s21 = smov 8   ;;  %s2822_s9 = smov 24  }
 0x10b   : > { %2245 = vmatprep.subr.bf16.mxu0 %v2815_v0  ;;  %2250 = vmatpush3.bf16.msra.mxu1 %v2249_v12  ;;  %v2258_v17 = vpack.c.bf16 %v793_v16, %v792_v15  ;;  %v674_v19 = vld [vmem:[#allocation12 + $0x18] sm:$0xff]  ;;  %s2823_s28 = smov 16   ;;  %vm1563_vm5 = vcmask 261312   ;;  %s3490_s16 = sld [smem:[#allocation37_spill]] }
 0x10c   : > { %2251 = vmatprep.subr.bf16.mxu1 %v2815_v0  ;;  %v2252_v20 = vpack.c.bf16 %v674_v19, %v673_v18  ;;  %s580_s15 = scalar_lea.vmem [#allocation21], %s3194_s23  ;;  %p3495_p5 = scmp.ne.s32.totalorder %s3482_s20, 0 }
 0x10d   : > { %v2060_v21 = vld [vmem:[%s3488_s13] ss:$0 sm:$0xff]  ;;  %s1855_s13 = sshll.u32 %s580_s15, 4  ;;  %s2824_s14 = smov [#allocation21]   ;;  %s3357_s13 = int_to_ptr.vmem [resolvable:$true] %s1855_s13 }
 0x10e   : > { %2247 = vmatpush3.bf16.msra.mxu0 %v2246_v7  ;;  %s2673_s2 = scalar_lea.vmem %s3357_s13, 128  ;;  %s2677_s3 = sshll.u32 %s2824_s14, 4  ;;  %s2678_s3 = int_to_ptr.vmem [resolvable:$false] %s2677_s3 }
 0x10f   : > { %2254 = vmatprep.subr.bf16.mxu0 %v2815_v0  ;;  %2253 = vmatpush3.bf16.msra.mxu1 %v2252_v20  ;;  %v2064_v25 = vld [vmem:[%s3489_s18] ss:$0 sm:$0xff]  ;;  %s3493_s18 = sld [smem:[#allocation40_spill]]  ;;  %p2674_p6 = scmp.ne.s32.totalorder %s3357_s13, %s2673_s2 }
 0x110   : > { %2169 = vmatprep.subr.mxu1 %v2817_v1  ;;  %s2679_s5 = scalar_lea.vmem %s2678_s3, 256  ;;  %p2680_p2 = scmp.lt.s32.totalorder %s3357_s13, %s2678_s3 }
 0x111   : > { %2145 = vmatmul.mubr.msk.f32.vlgmr.msra.gmra.mrb[0].mxu0 %vm597_vm1, %v585_v13  ;;  %p2675_p10 = pnand %p2674_p6, %p3495_p5  ;;  %p2681_p4 = scmp.lt.s32.totalorder %s2679_s5, %s2673_s2 }
 0x112   : > { %2256 = vmatpush3.bf16.msra.mxu0 %v2255_v14  ;;  %2166 = vmatprep.mubr.msk.f32.mxu0 %vm2816_vm0, %v2817_v1 }
 0x113   : > { %2257 = vmatprep.subr.bf16.mxu0 %v2815_v0  ;;  %2156 = vmatmul.mubr.msk.f32.vlgmr.msra.gmra.mrb[0].mxu1 %vm597_vm1, %v585_v13  ;;  %p2676_p1 = pneg %p2675_p10  ;;  %p2682_p9 = por %p2681_p4, %p2680_p2 }
 0x114   : > { %2171 = vmatprep.mubr.msk.f32.mxu1 %vm2816_vm0, %v2817_v1 }
 0x115   : > { %p2683_p8 = pnand %p2682_p9, %p2676_p1 }
 0x116   : > { %2259 = vmatpush3.bf16.msra.mxu0 %v2258_v17 }
 0x117   : > { %2189 = vmatprep.subr.mxu0 %v2817_v1 }
 0x119   : > { %2167 = vmatmul.mubr.msk.f32.vlgmr.msra.gmra.mrb[2].mxu0 %vm597_vm1, %v585_v13 }
 0x11a   : > { %2191 = vmatprep.mubr.msk.f32.mxu0 %vm2816_vm0, %v2817_v1 }
 0x1e4   : > { %v667_v22 = vpop.f32.mrb[0].mxu0 }
 0x1e5   : > { %v668_v23 = vadd.f32 %v2060_v21, %v667_v22  ;;  %v2146_v24 = vpop.f32.mrb[1].mxu0 }
 0x1e6   : > { %v748_v33 = vpop.f32.mrb[0].mxu1 }
 0x1e7   : > { %753 = vst.msk [vmem:[#allocation2] sm:$0xff] %vm752_vm2, %v668_v23  ;;  %767 = vrot.lane.b32.xlu1 %v668_v23, %s2818_s4  ;;  %756 = vrot.lane.b32.xlu0 %v668_v23, %s2819_s11  ;;  %v3263_v34 = vadd.f32 %v2062_v32, %v748_v33  ;;  %v2157_v35 = vpop.f32.mrb[1].mxu1 }
 0x1e9   : > { %754 = vst.msk [vmem:[#allocation3] sm:$0xff] %vm752_vm2, %v3263_v34 }
 0x1ec   : > { %v871_v26 = vpop.f32.mrb[2].mxu0 }
 0x1ed   : > { %v3250_v27 = vadd.f32 %v2064_v25, %v871_v26  ;;  %v2168_v28 = vpop.f32.mrb[3].mxu0 }
 0x1ee   : > { %v898_v29 = vld [vmem:[#allocation2] sm:$0xff] }
 0x1ef   : > { %v875_v30 = vmul.f32 0.35355338, %v3250_v27  ;;  %2170 = vmatpush3.xpose.msk.msra.mxu1 %vm752_vm2, %v898_v29 }
 0x1f0   : > { %2174 = vmatprep.subr.mxu1 %v2817_v1  ;;  %v1250_v48 = vld [vmem:[#allocation3] sm:$0xff] }
 0x1f1   : > { %877 = vst.msk [vmem:[#allocation4] sm:$0xff] %vm752_vm2, %v875_v30  ;;  %884 = vrot.lane.b32.xlu1 %v875_v30, %s2818_s4  ;;  %879 = vrot.lane.b32.xlu0 %v875_v30, %s2819_s11 }
 0x1f2   : > { %2190 = vmatpush3.msra.mxu0 %v1250_v48 }
 0x1f3   : > { %2199 = vmatprep.subr.mxu0 %v2817_v1 }
 0x1f5   : > { %889 = vrot.lane.b32.xlu1 %v875_v30, %s2820_s1  ;;  %777 = vrot.lane.b32.xlu0 %v668_v23, %s2820_s1 }
 0x1f8   : > { %v894_v31 = vld [vmem:[#allocation4] sm:$0xff] }
 0x1f9   : > { %2172 = vmatmul.mubr.msk.f32.vlgmr.msra.gmra.mrb[2].mxu1 %vm752_vm2, %v894_v31 }
 0x1fa   : > { %2176 = vmatprep.mubr.msk.f32.mxu1 %vm2816_vm0, %v2817_v1 }
 0x259   : > { %v768_v36 = vpop.permute.xlu1 %767  ;;  %v757_v37 = vpop.permute.xlu0 %756 }
 0x25a   : > { %771 = vst.msk [vmem:[#allocation2 + $0x10] sm:$0xff] %vm752_vm2, %v768_v36  ;;  %760 = vst.msk [vmem:[#allocation2 + $0x8] sm:$0xff] %vm752_vm2, %v757_v37 }
 0x261   : > { %v899_v38 = vld [vmem:[#allocation2 + $0x8] sm:$0xff]  ;;  %v900_v44 = vld [vmem:[#allocation2 + $0x10] sm:$0xff] }
 0x262   : > { %2175 = vmatpush3.xpose.msk.msra.mxu1 %vm752_vm2, %v899_v38 }
 0x263   : > { %v885_v39 = vpop.permute.xlu1 %884  ;;  %v880_v40 = vpop.permute.xlu0 %879  ;;  %2179 = vmatprep.subr.mxu1 %v2817_v1 }
 0x264   : > { %888 = vst.msk [vmem:[#allocation4 + $0x10] sm:$0xff] %vm752_vm2, %v885_v39  ;;  %883 = vst.msk [vmem:[#allocation4 + $0x8] sm:$0xff] %vm752_vm2, %v880_v40  ;;  %v1566_v40 = vld [vmem:[#allocation15] sm:$0xff] }
 0x267   : > { %v890_v41 = vpop.permute.xlu1 %889  ;;  %v778_v42 = vpop.permute.xlu0 %777 }
 0x268   : > { %893 = vst.msk [vmem:[#allocation4 + $0x18] sm:$0xff] %vm752_vm2, %v890_v41  ;;  %781 = vst.msk [vmem:[#allocation2 + $0x18] sm:$0xff] %vm752_vm2, %v778_v42  ;;  %v1567_v41 = vld [vmem:[#allocation15 + $0x8] sm:$0xff] }
 0x269   : > { %v2261_v42 = vpack.c.bf16 %v1567_v41, %v1566_v40 }
 0x26b   : > { %v895_v43 = vld [vmem:[#allocation4 + $0x8] sm:$0xff]  ;;  %v896_v45 = vld [vmem:[#allocation4 + $0x10] sm:$0xff] }
 0x26c   : > { %2177 = vmatmul.mubr.msk.f32.vlgmr.msra.gmra.mrb[4].mxu1 %vm752_vm2, %v895_v43  ;;  %v1568_v43 = vld [vmem:[#allocation15 + $0x10] sm:$0xff] }
 0x26d   : > { %2180 = vmatpush3.xpose.msk.msra.mxu1 %vm752_vm2, %v900_v44  ;;  %2181 = vmatprep.mubr.msk.f32.mxu1 %vm2816_vm0, %v2817_v1  ;;  %v1569_v44 = vld [vmem:[#allocation15 + $0x18] sm:$0xff] }
 0x26e   : > { %2184 = vmatprep.subr.mxu1 %v2817_v1 }
 0x26f   : > { %v901_v46 = vld [vmem:[#allocation2 + $0x18] sm:$0xff] }
 0x270   : > { %2182 = vmatmul.mubr.msk.f32.vlgmr.msra.gmra.mrb[6].mxu1 %vm752_vm2, %v896_v45  ;;  %v897_v47 = vld [vmem:[#allocation4 + $0x18] sm:$0xff]  ;;  %v2264_v45 = vpack.c.bf16 %v1569_v44, %v1568_v43 }
 0x271   : > { %2185 = vmatpush3.xpose.msk.msra.mxu1 %vm752_vm2, %v901_v46  ;;  %2186 = vmatprep.mubr.msk.f32.mxu1 %vm2816_vm0, %v2817_v1 }
 0x272   : > { %2194 = vmatprep.subr.mxu1 %v2817_v1 }
 0x274   : > { %2187 = vmatmul.mubr.msk.f32.vlgmr.msra.gmra.mrb[8].mxu1 %vm752_vm2, %v897_v47 }
 0x275   : > { %2196 = vmatprep.mubr.msk.f32.mxu1 %vm2816_vm0, %v2817_v1 }
 0x2cc   : > { %v974_v49 = vpop.f32.mrb[2].mxu1 }
 0x2cd   : > { %v2173_v50 = vpop.f32.mrb[3].mxu1  ;;  %v1206_v51 = vsel %vm752_vm2, %v974_v49, -inf }
 0x2ce   : > { %1207 = vmax.xlane.f32.xlu0 %v1206_v51 }
 0x33f   : > { %v1050_v52 = vpop.f32.mrb[4].mxu1 }
 0x340   : > { %v2178_v53 = vpop.f32.mrb[5].mxu1  ;;  %v1209_v54 = vsel %vm752_vm2, %v1050_v52, -inf }
 0x341   : > { %1210 = vmax.xlane.f32.xlu1 %v1209_v54  ;;  %v1655_v53 = vld [vmem:[#allocation18 + $0x8] sm:$0xff] }
 0x343   : > { %v1126_v55 = vpop.f32.mrb[6].mxu1 }
 0x344   : > { %v2183_v56 = vpop.f32.mrb[7].mxu1  ;;  %v1212_v57 = vsel %vm752_vm2, %v1126_v55, -inf }
 0x345   : > { %1213 = vmax.xlane.f32.xlu0 %v1212_v57 }
 0x347   : > { %v1202_v58 = vpop.f32.mrb[8].mxu1 }
 0x348   : > { %v2188_v59 = vpop.f32.mrb[9].mxu1  ;;  %v1215_v60 = vsel %vm752_vm2, %v1202_v58, -inf }
 0x349   : > { %1216 = vmax.xlane.f32.xlu0 %v1215_v60  ;;  %v1651_v59 = vld [vmem:[%s3490_s16 + $0x8] sm:$0xff] }
 0x352   : > { %762 = vrot.lane.b32.xlu1 %v3263_v34, %s2819_s11 }
 0x35b   : > { %v1208_v61 = vpop.xlane.xlu0 %1207 }
 0x35c   : > { %v1218_v62 = vsub.f32 %v974_v49, %v1208_v61  ;;  %v1652_v61 = vld [vmem:[%s3490_s16 + $0x10] sm:$0xff] }
 0x35e   : > { %v1222_v63 = vmul.f32 1.442695, %v1218_v62  ;;  %v1653_v62 = vld [vmem:[%s3490_s16 + $0x18] sm:$0xff] }
 0x360   : > { %2427 = vpow2.f32 %v1222_v63 }
 0x36a   : > { %v2428_v2 = vpop.eup %2427 }
 0x36b   : > { %v1230_v3 = vsel %vm752_vm2, %v2428_v2, 0.0 }
 0x376   : > { %1231 = vadd.xlane.f32.xlu1 %v1230_v3  ;;  %v1656_v3 = vld [vmem:[#allocation18 + $0x10] sm:$0xff] }
 0x3ce   : > { %v1211_v4 = vpop.xlane.xlu1 %1210 }
 0x3cf   : > { %v1219_v5 = vsub.f32 %v1050_v52, %v1211_v4  ;;  %v1654_v52 = vld [vmem:[#allocation18] sm:$0xff]  ;;  %v1657_v4 = vld [vmem:[#allocation18 + $0x18] sm:$0xff] }
 0x3d0   : > { %v2267_v54 = vpack.c.bf16 %v1655_v53, %v1654_v52 }
 0x3d1   : > { %v1224_v6 = vmul.f32 1.442695, %v1219_v5  ;;  %v2270_v5 = vpack.c.bf16 %v1657_v4, %v1656_v3 }
 0x3d2   : > { %v763_v7 = vpop.permute.xlu1 %762  ;;  %v1214_v8 = vpop.xlane.xlu0 %1213 }
 0x3d3   : > { %2429 = vpow2.f32 %v1224_v6  ;;  %766 = vst.msk [vmem:[#allocation3 + $0x8] sm:$0xff] %vm752_vm2, %v763_v7  ;;  %v1220_v9 = vsub.f32 %v1126_v55, %v1214_v8  ;;  %v2078_v6 = vld [vmem:[#allocation17] ss:$0 sm:$0xff] }
 0x3d5   : > { %v1226_v10 = vmul.f32 1.442695, %v1220_v9 }
 0x3d6   : > { %v1217_v11 = vpop.xlane.xlu0 %1216 }
 0x3d7   : > { %2431 = vpow2.f32 %v1226_v10  ;;  %v1221_v12 = vsub.f32 %v1202_v58, %v1217_v11  ;;  %v1650_v58 = vld [vmem:[%s3490_s16] sm:$0xff] }
 0x3d8   : > { %v2273_v60 = vpack.c.bf16 %v1651_v59, %v1650_v58 }
 0x3d9   : > { %v1228_v13 = vmul.f32 1.442695, %v1221_v12 }
 0x3da   : > { %v1251_v14 = vld [vmem:[#allocation3 + $0x8] sm:$0xff] }
 0x3db   : > { %2433 = vpow2.f32 %v1228_v13  ;;  %2195 = vmatpush3.msra.mxu1 %v1251_v14 }
 0x3dc   : > { %2204 = vmatprep.subr.mxu1 %v2817_v1 }
 0x3dd   : > { %v2430_v15 = vpop.eup %2429 }
 0x3de   : > { %v1233_v16 = vsel %vm752_vm2, %v2430_v15, 0.0 }
 0x3df   : > { %1234 = vadd.xlane.f32.xlu0 %v1233_v16 }
 0x3e1   : > { %v2432_v17 = vpop.eup %2431 }
 0x3e2   : > { %v1236_v18 = vsel %vm752_vm2, %v2432_v17, 0.0 }
 0x3e3   : > { %1237 = vadd.xlane.f32.xlu1 %v1236_v18 }
 0x3e5   : > { %v2434_v19 = vpop.eup %2433 }
 0x3e6   : > { %v1239_v20 = vsel %vm752_vm2, %v2434_v19, 0.0 }
 0x3e7   : > { %1240 = vadd.xlane.f32.xlu0 %v1239_v20 }
 0x3f4   : > { %782 = vrot.lane.b32.xlu1 %v3263_v34, %s2820_s1  ;;  %s3491_s1 = sld [smem:[#allocation30_spill]] }
 0x3fa   : > { %s2086_s24 = sshll.u32 %s3491_s1, 7  ;;  %s3494_s1 = sld [smem:[#allocation39_spill]] }
 0x3fd   : > { %772 = vrot.lane.b32.xlu0 %v3263_v34, %s2818_s4  ;;  %s3459_s4 = scalar_lea.vmem [#allocation20], %s3194_s23 }
 0x3fe   : > { %s1841_s11 = sshll.u32 %s3459_s4, 4  ;;  %s1827_s4 = scalar_lea.sflag [#allocation22], %s3191_s17  ;;  %s3364_s11 = int_to_ptr.vmem [resolvable:$true] %s1841_s11 }
 0x400   : > { %s3362_s0 = scalar_lea.hbm %s3494_s1, %s2086_s24 }
 0x403   : > { %v1232_v21 = vpop.xlane.xlu1 %1231 }
 0x404   : > { %2435 = vrcp.f32 %v1232_v21 }
 0x40e   : > { %v2436_v22 = vpop.eup %2435 }
 0x40f   : > { %v1246_v23 = vmul.f32 %v2436_v22, %v2428_v2  ;;  %v2276_v2 = vpack.c.bf16 %v1653_v62, %v1652_v61 }
 0x411   : > { %2192 = vmatmul.mubr.msk.f32.vlgmr.msra.gmra.mrb[4].mxu0 %vm752_vm2, %v1246_v23 }
 0x412   : > { %2201 = vmatprep.mubr.msk.f32.mxu0 %vm2816_vm0, %v2817_v1 }
 0x46c   : > { %v1235_v24 = vpop.xlane.xlu0 %1234 }
 0x46d   : > { %2437 = vrcp.f32 %v1235_v24 }
 0x470   : > { %v1238_v25 = vpop.xlane.xlu1 %1237 }
 0x471   : > { %2439 = vrcp.f32 %v1238_v25 }
 0x474   : > { %v783_v26 = vpop.permute.xlu1 %782  ;;  %v1241_v28 = vpop.xlane.xlu0 %1240 }
 0x475   : > { %786 = vst.msk [vmem:[#allocation3 + $0x18] sm:$0xff] %vm752_vm2, %v783_v26  ;;  %2441 = vrcp.f32 %v1241_v28 }
 0x477   : > { %v2438_v29 = vpop.eup %2437 }
 0x478   : > { %v1247_v30 = vmul.f32 %v2438_v29, %v2430_v15  ;;  %v773_v31 = vpop.permute.xlu0 %772 }
 0x479   : > { %776 = vst.msk [vmem:[#allocation3 + $0x10] sm:$0xff] %vm752_vm2, %v773_v31 }
 0x47a   : > { %2197 = vmatmul.mubr.msk.f32.vlgmr.msra.gmra.mrb[10].mxu1 %vm752_vm2, %v1247_v30 }
 0x47b   : > { %2206 = vmatprep.mubr.msk.f32.mxu1 %vm2816_vm0, %v2817_v1  ;;  %v2440_v33 = vpop.eup %2439 }
 0x47c   : > { %v1253_v32 = vld [vmem:[#allocation3 + $0x18] sm:$0xff]  ;;  %v1248_v35 = vmul.f32 %v2440_v33, %v2432_v17 }
 0x47d   : > { %2205 = vmatpush3.msra.mxu1 %v1253_v32 }
 0x47e   : > { %2266 = vmatprep.subr.bf16.mxu1 %v2815_v0 }
 0x47f   : > { %v2442_v34 = vpop.eup %2441 }
 0x480   : > { %v1249_v36 = vmul.f32 %v2442_v34, %v2434_v19  ;;  %v1252_v37 = vld [vmem:[#allocation3 + $0x10] sm:$0xff] }
 0x481   : > { %2200 = vmatpush3.msra.mxu0 %v1252_v37 }
 0x482   : > { %2202 = vmatmul.mubr.msk.f32.vlgmr.msra.gmra.mrb[6].mxu0 %vm752_vm2, %v1248_v35  ;;  %2207 = vmatmul.mubr.msk.f32.vlgmr.msra.gmra.mrb[12].mxu1 %vm752_vm2, %v1249_v36 }
 0x483   : > { %2260 = vmatprep.subr.bf16.mxu0 %v2815_v0  ;;  %2217 = vmatprep.mubr.msk.f32.mxu0 %vm2816_vm0, %v2817_v1 }
 0x484   : > { %2228 = vmatprep.mubr.msk.f32.mxu1 %vm2816_vm0, %v2817_v1  ;;  %2262 = vmatpush3.bf16.msra.mxu0 %v2261_v42 }
 0x485   : > { %2263 = vmatprep.subr.bf16.mxu0 %v2815_v0  ;;  %2268 = vmatpush3.bf16.msra.mxu1 %v2267_v54 }
 0x486   : > { %2269 = vmatprep.subr.bf16.mxu1 %v2815_v0 }
 0x488   : > { %2265 = vmatpush3.bf16.msra.mxu0 %v2264_v45 }
 0x489   : > { %2272 = vmatprep.subr.bf16.mxu0 %v2815_v0  ;;  %2271 = vmatpush3.bf16.msra.mxu1 %v2270_v5 }
 0x4e4   : > { %v1323_v38 = vpop.f32.mrb[4].mxu0 }
 0x4e5   : > { %1546 = vst.msk [vmem:[#allocation5] sm:$0xff] %vm752_vm2, %v1323_v38  ;;  %v2193_v39 = vpop.f32.mrb[5].mxu0 }
 0x54d   : > { %v1396_v46 = vpop.f32.mrb[10].mxu1 }
 0x54e   : > { %1548 = vrot.lane.b32.xlu1 %v1396_v46, %s2821_s21  ;;  %v2198_v47 = vpop.f32.mrb[11].mxu1  ;;  %s3355_s21 = scalar_lea.hbm %s3493_s18, %s2086_s24 }
 0x555   : > { %v1469_v48 = vpop.f32.mrb[6].mxu0  ;;  %v1542_v49 = vpop.f32.mrb[12].mxu1 }
 0x556   : > { %1560 = vrot.lane.b32.xlu1 %v1542_v49, %s2822_s9  ;;  %v2208_v50 = vpop.f32.mrb[13].mxu1  ;;  %1554 = vrot.lane.b32.xlu0 %v1469_v48, %s2823_s28  ;;  %v2203_v51 = vpop.f32.mrb[7].mxu0  ;;  %s3492_s28 = sld [smem:[#allocation38_spill]] }
 0x5c0   : > { %v1549_v55 = vpop.permute.xlu1 %1548 }
 0x5c1   : > { %1552 = vst.msk [vmem:[#allocation5] sm:$0xff] %vm1551_vm3, %v1549_v55 }
 0x5c8   : > { %v1561_v56 = vpop.permute.xlu1 %1560  ;;  %v1555_v57 = vpop.permute.xlu0 %1554 }
 0x5c9   : > { %1558 = vst.msk [vmem:[#allocation5] sm:$0xff] %vm1557_vm4, %v1555_v57 }
 0x5ca   : > { %1564 = vst.msk [vmem:[#allocation5] sm:$0xff] %vm1563_vm5, %v1561_v56 }
 0x5d1   : > { %v1565_v63 = vld [vmem:[#allocation5] sm:$0xff] }
 0x5d2   : > { %2218 = vmatmul.mubr.msk.f32.vlgmr.msra.gmra.mrb[8].mxu0 %vm597_vm1, %v1565_v63 }
 0x5d3   : > { %2274 = vmatpush3.bf16.msra.mxu0 %v2273_v60  ;;  %2239 = vmatprep.mubr.msk.f32.mxu0 %vm2816_vm0, %v2817_v1 }
 0x5d4   : > { %2275 = vmatprep.subr.bf16.mxu0 %v2815_v0 }
 0x5d7   : > { %2277 = vmatpush3.bf16.msra.mxu0 %v2276_v2 }
 0x5da   : > { %2240 = vmatmul.mubr.msk.f32.vlgmr.msra.gmra.mrb[10].mxu0 %vm597_vm1, %v3250_v27  ;;  %v2082_v27 = vld [vmem:[%s3492_s28] ss:$0 sm:$0xff] }
 0x6a5   : > { %v1646_v7 = vpop.f32.mrb[8].mxu0 }
 0x6a6   : > { %v1647_v8 = vadd.f32 %v2078_v6, %v1646_v7  ;;  %v2219_v9 = vpop.f32.mrb[9].mxu0 }
 0x6a8   : > { %2229 = vmatmul.mubr.msk.f32.vlgmr.msra.gmra.mrb[14].mxu1 %vm597_vm1, %v1647_v8 }
 0x6ad   : > { %v1800_v1 = vpop.f32.mrb[10].mxu0 }
 0x6ae   : > { %v2241_v0 = vpop.f32.mrb[11].mxu0 }
 0x77b   : > { %v1727_v10 = vpop.f32.mrb[14].mxu1 }
 0x77c   : > { %v1801_v11 = vadd.f32 %v1800_v1, %v1727_v10  ;;  %v2230_v12 = vpop.f32.mrb[15].mxu1 }
 0x77e   : > { %v1811_v13 = vadd.f32 %v2082_v27, %v1801_v11 }
 0x780   : > { %v2083_v14 = vmul.f32 -1.442695, %v1811_v13 }
 0x782   : > { %2443 = vpow2.f32 %v2083_v14 }
 0x78c   : > { %v2444_v15 = vpop.eup %2443 }
 0x78d   : > { %v1815_v16 = vadd.f32 1.0, %v2444_v15 }
 0x78f   : > { %2445 = vrcp.f32 %v1815_v16 }
 0x799   : > { %v2446_v17 = vpop.eup %2445 }
 0x79a   : > { %v1818_v18 = vmul.f32 %v2446_v17, %v1647_v8  ;;  %1820 = vst.msk [vmem:[%s580_s15] sm:$0xff] %vm597_vm1, %v2446_v17 }
 0x79b   : > { %2686 = shalt.err (!%p2683_p8)
}
 0x79c   : > { %s2687_s24 = scalar_lea.hbm %s3355_s21, 128  ;;  %s2691_s28 = scalar_lea.hbm %s3493_s18, 256 }
 0x79d   : > { %p2688_p3 = scmp.ne.s32.totalorder %s3355_s21, %s2687_s24  ;;  %p2692_p0 = scmp.lt.u32.totalorder %s3355_s21, %s3493_s18 }
 0x79e   : > { %p2693_p11 = scmp.lt.u32.totalorder %s2691_s28, %s2687_s24  ;;  %p2695_p6 = scmp.lt.u32.totalorder %s2687_s24, %s3355_s21 }
 0x79f   : > { %p2689_p12 = pnand %p2688_p3, %p3495_p5 }
 0x7a0   : > { %p2694_p7 = por %p2693_p11, %p2692_p0 }
 0x7a1   : > { %p2690_p13 = pneg %p2689_p12 }
 0x7a2   : > { %p2696_p10 = por %p2695_p6, %p2694_p7 }
 0x7a4   : > { %p2697_p1 = pnand %p2696_p10, %p2690_p13 }
 0x7a6   : > { %2700 = shalt.err (!%p2697_p1)
}
 0x7a7   : > { %2309 = dma.vmem_to_hbm [thread:$0]  (%p3495_p5), %s3357_s13, 128, %s3355_s21, %s1827_s4  }
 0x7a8   : > { %s3496_s5 = scalar_lea.vmem [#allocation20], %s3194_s23  ;;  %s1822_s2 = scalar_lea.sflag [#allocation8], %s3191_s17 }
 0x7a9   : > { %1819 = vst.msk [vmem:[%s3496_s5] sm:$0xff] %vm597_vm1, %v1818_v18  ;;  %s2701_s15 = scalar_lea.vmem %s3364_s11, 128  ;;  %s2825_s24 = smov [#allocation20]  }
 0x7aa   : > { %p2702_p2 = scmp.ne.s32.totalorder %s3364_s11, %s2701_s15  ;;  %s2705_s9 = sshll.u32 %s2825_s24, 4  ;;  %s2706_s9 = int_to_ptr.vmem [resolvable:$false] %s2705_s9 }
 0x7ab   : > { %s2707_s28 = scalar_lea.vmem %s2706_s9, 256  ;;  %p2708_p8 = scmp.lt.s32.totalorder %s3364_s11, %s2706_s9 }
 0x7ac   : > { %p2703_p4 = pnand %p2702_p2, %p3495_p5  ;;  %p2709_p3 = scmp.lt.s32.totalorder %s2707_s28, %s2701_s15 }
 0x7ae   : > { %p2704_p9 = pneg %p2703_p4  ;;  %p2710_p12 = por %p2709_p3, %p2708_p8 }
 0x7b0   : > { %p2711_p13 = pnand %p2710_p12, %p2704_p9 }
 0x7b2   : > { %2714 = shalt.err (!%p2711_p13)
}
 0x7b3   : > { %s2715_s17 = scalar_lea.hbm %s3362_s0, 128  ;;  %s2719_s4 = scalar_lea.hbm %s3494_s1, 256 }
 0x7b4   : > { %p2716_p0 = scmp.ne.s32.totalorder %s3362_s0, %s2715_s17  ;;  %p2720_p6 = scmp.lt.u32.totalorder %s3362_s0, %s3494_s1 }
 0x7b5   : > { %p2721_p10 = scmp.lt.u32.totalorder %s2719_s4, %s2715_s17  ;;  %p2723_p2 = scmp.lt.u32.totalorder %s2715_s17, %s3362_s0 }
 0x7b6   : > { %p2717_p11 = pnand %p2716_p0, %p3495_p5 }
 0x7b7   : > { %p2722_p1 = por %p2721_p10, %p2720_p6 }
 0x7b8   : > { %p2718_p7 = pneg %p2717_p11 }
 0x7b9   : > { %p2724_p4 = por %p2723_p2, %p2722_p1 }
 0x7bb   : > { %p2725_p9 = pnand %p2724_p4, %p2718_p7 }
 0x7bd   : > { %2728 = shalt.err (!%p2725_p9)
}
 0x7be   : > { %2308 = dma.vmem_to_hbm [thread:$0]  (%p3495_p5), %s3364_s11, 128, %s3362_s0, %s1822_s2  }
 0x7bf PF: > { %s1867_s3 = sand.u32 1, %s2783_s25   ;;  %p3497_p8 = scmp.ne.s32.totalorder %s3483_s12, 0 }
 0x7c0   : > { %p3498_p3 = scmp.ge.s32.totalorder %s2803_s30, 2  ;;  %s1868_s5 = scalar_lea.sflag [#allocation8], %s1867_s3 }
 0x7c2   : > { %p2339_p12 = pnand %p3498_p3, %p3497_p8 }
 0x7c4   : > { %2774 = dma.done.wait (!%p2339_p12), %s1868_s5, 128  }
 0x7c5   : > { %2776 = vsyncadd (!%p2339_p12), %s1868_s5, 4294967168  ;;  %s1877_s15 = scalar_lea.sflag [#allocation22], %s1867_s3 }
 0x7c6   : > { %2778 = dma.done.wait (!%p2339_p12), %s1877_s15, 128  }
 0x7c7   : > { %2780 = vsyncadd (!%p2339_p12), %s1877_s15, 4294967168  ;;  %s37_s30 = sadd.s32 1, %s2803_s30   ;;  %s3499_s25 = smov %s2787_s26 }
 0x7c8   : > { %p34_p13 = scmp.ge.s32.totalorder %s37_s30, 4   ;;  %s3500_s26 = smov %s2791_s27 }
 0x7c9   : > { %s3501_s27 = smov %s3142_s22  ;;  %s3502_s28 = smov %s2799_s29 }
 0x7ca   : > { %s3503_s29 = smov %s3505_s19  ;;  %36 = sbr.rel (!%p34_p13) target bundleno = 23 (0x17), region = 172 }
 0x7d1   :  { %1882 = vsyncpa [#allocation7], 1 }
 0x7d2   :  { %1884 = vsyncpa [#allocation7 + $0x1], 1 }
 0x7d3   :  { %1885 = vsyncpa [#allocation10], 1 }
 0x7d4   :  { %1886 = vsyncpa [#allocation13], 1 }
 0x7d5   :  { %1887 = vsyncpa [#allocation16], 1 }
 0x7d6   :  { %1888 = vsyncpa [#allocation19], 1 }
 0x7d7   :  { %1889 = vsyncpa [#allocation8], 1 }
 0x7d8   :  { %1891 = vsyncpa [#allocation8 + $0x1], 1 }
 0x7d9   :  { %1892 = vsyncpa [#allocation22], 1 }
 0x7da   :  { %1894 = vsyncpa [#allocation22 + $0x1], 1 }

</bundles_post_ra>
